<compile_context>
chip_gen: v7x
topology: tpu7x:2x2x1
jax: 0.10.0
libtpu: 0.0.40
codegen_flags: <defaults>
</compile_context>

<pallas_src>
import jax
import jax.numpy as jnp
from jax.experimental import pallas as pl
from jax.experimental.pallas import tpu as pltpu

_VMEM_LIMIT = 32 * 1024 * 1024
_NEG_SLOPE = 0.2
_BN_EPS = 1e-5
_MAX_TILE_M = 2048   # per-tile M cap (K<=512 bf16 -> <=2 MiB/block)


def _tensorcores_per_chip():
    # v7x (and v4 / v5p megacore) expose 2 TensorCores per device that a
    # "parallel" grid axis can shard across; v5e / v6e have 1.
    try:
        kind = jax.devices()[0].device_kind.lower()
    except Exception:
        return 1
    return 2 if any(t in kind for t in ("v4", "v5p", "v7")) else 1


_TC_PER_CHIP = _tensorcores_per_chip()


def _choose_tile_m(m):
    """Lane-aligned divisor of m, VMEM-bounded.  On multi-TC chips split the
    M axis >= 2 ways so the "parallel" grid feeds both TensorCores; on 1-TC
    chips use a single full-M tile (removes per-grid-step overhead)."""
    if m % 128 != 0:
        return m                      # single tile: block dim == full dim
    cap = _MAX_TILE_M
    if _TC_PER_CHIP >= 2:
        cap = min(cap, max(128, m // 2))
    if m <= cap:
        return m
    t = 128
    while t * 2 <= cap and m % (t * 2) == 0:
        t *= 2
    return t


def _full_spec(shape):
    return pl.BlockSpec(shape, lambda i: (0,) * len(shape))


# ------------------------------ Pallas kernels -------------------------------
def _gemm_bias_lrelu_kernel(p_ref, w_ref, b_ref, o_ref):
    # (Cout, K) @ (K, TILE_M) on the MXU; bias + LeakyReLU fused with the store.
    y = jnp.dot(w_ref[...], p_ref[...], preferred_element_type=jnp.float32)
    y = y + b_ref[...]
    o_ref[...] = jnp.where(y >= 0.0, y, _NEG_SLOPE * y).astype(o_ref.dtype)


def _conv_bn_lrelu_kernel(p_ref, w_ref, b_ref, g_ref, bt_ref, o_ref):
    # Fully fused Conv3d(GEMM) + BatchNorm3d(train, biased var) + LeakyReLU.
    # The whole (Cout, M) pre-BN activation stays on-chip: no HBM round trip.
    y = jnp.dot(w_ref[...], p_ref[...], preferred_element_type=jnp.float32)
    y = y + b_ref[...]
    mean = jnp.mean(y, axis=1, keepdims=True)
    var = jnp.maximum(jnp.mean(y * y, axis=1, keepdims=True) - mean * mean, 0.0)
    scale = g_ref[...] * jax.lax.rsqrt(var + _BN_EPS)
    shift = bt_ref[...] - mean * scale
    h = y * scale + shift
    o_ref[...] = jnp.where(h >= 0.0, h, _NEG_SLOPE * h).astype(o_ref.dtype)


def _conv_bn_lrelu_final_sigmoid_kernel(p_ref, w_ref, b_ref, g_ref, bt_ref,
                                         wf_ref, bf_ref, o_ref):
    # d3 fused with the final 1x1 Conv3d + exact Sigmoid epilogue.
    y = jnp.dot(w_ref[...], p_ref[...], preferred_element_type=jnp.float32)
    y = y + b_ref[...]
    mean = jnp.mean(y, axis=1, keepdims=True)
    var = jnp.maximum(jnp.mean(y * y, axis=1, keepdims=True) - mean * mean, 0.0)
    scale = g_ref[...] * jax.lax.rsqrt(var + _BN_EPS)
    shift = bt_ref[...] - mean * scale
    h = y * scale + shift
    h = jnp.where(h >= 0.0, h, _NEG_SLOPE * h)
    z = jnp.dot(wf_ref[...], h, preferred_element_type=jnp.float32) + bf_ref[...]
    o_ref[...] = (1.0 / (1.0 + jnp.exp(-z))).astype(o_ref.dtype)


# -------------------------------- JAX glue -----------------------------------
def _im2col_T(x, kernel=4, stride=2, pad=1):
    # x: (C, N, D, H, W) -> patches (K, M); K ordered (kd, kh, kw, c),
    # M ordered (n, do, ho, wo).  Keeps the input dtype (bf16 here), so the
    # gather / stack / reshape all run at half width.
    C, N, D, H, W = x.shape
    xp = jnp.pad(x, ((0, 0), (0, 0), (pad, pad), (pad, pad), (pad, pad)))
    Do = (D + 2 * pad - kernel) // stride + 1
    Ho = (H + 2 * pad - kernel) // stride + 1
    Wo = (W + 2 * pad - kernel) // stride + 1
    cols = []
    for kd in range(kernel):
        for kh in range(kernel):
            for kw in range(kernel):
                cols.append(xp[:, :, kd:kd + stride * Do:stride,
                                     kh:kh + stride * Ho:stride,
                                     kw:kw + stride * Wo:stride])
    patches = jnp.stack(cols, axis=0)                  # (k^3, C, N, Do, Ho, Wo)
    patches = patches.reshape(kernel ** 3 * C, N * Do * Ho * Wo)
    return patches, (N, Do, Ho, Wo)


def _weight_to_matrix_T(w):
    # PyTorch Conv3d weight (Cout, Cin, kD, kH, kW) -> (Cout, kD*kH*kW*Cin)
    # with K ordered (kd, kh, kw, cin) to match _im2col_T.
    cout, cin, kd, kh, kw = w.shape
    return jnp.transpose(w, (0, 2, 3, 4, 1)).reshape(cout, kd * kh * kw * cin)


def downsample_no_bn(x, w, b):
    # DownSampleConv(batchnorm=False): Conv3d(k=4,s=2,p=1) + LeakyReLU(0.2).
    patches, (N, Do, Ho, Wo) = _im2col_T(x)
    K, M = patches.shape
    cout = w.shape[0]
    tm = _choose_tile_m(M)
    out = pl.pallas_call(
        _gemm_bias_lrelu_kernel,
        grid=(M // tm,),
        in_specs=[pl.BlockSpec((K, tm), lambda i: (0, i)),
                  _full_spec((cout, K)),
                  _full_spec((cout, 1))],
        out_specs=pl.BlockSpec((cout, tm), lambda i: (0, i)),
        out_shape=jax.ShapeDtypeStruct((cout, M), jnp.bfloat16),
        compiler_params=pltpu.CompilerParams(
            dimension_semantics=("parallel",),
            vmem_limit_bytes=_VMEM_LIMIT),
    )(patches,
      _weight_to_matrix_T(w).astype(jnp.bfloat16),
      b.reshape(cout, 1).astype(jnp.float32))
    return out.reshape(cout, N, Do, Ho, Wo)


def downsample_bn(x, w, b, gamma, beta):
    # DownSampleConv: Conv3d + BatchNorm3d(train) + LeakyReLU(0.2), one call.
    patches, (N, Do, Ho, Wo) = _im2col_T(x)
    K, M = patches.shape
    cout = w.shape[0]
    out = pl.pallas_call(
        _conv_bn_lrelu_kernel,
        grid=(1,),
        in_specs=[_full_spec((K, M)),
                  _full_spec((cout, K)),
                  _full_spec((cout, 1)),
                  _full_spec((cout, 1)),
                  _full_spec((cout, 1))],
        out_specs=_full_spec((cout, M)),
        out_shape=jax.ShapeDtypeStruct((cout, M), jnp.bfloat16),
        compiler_params=pltpu.CompilerParams(
            dimension_semantics=("arbitrary",),
            vmem_limit_bytes=_VMEM_LIMIT),
    )(patches,
      _weight_to_matrix_T(w).astype(jnp.bfloat16),
      b.reshape(cout, 1).astype(jnp.float32),
      gamma.reshape(cout, 1).astype(jnp.float32),
      beta.reshape(cout, 1).astype(jnp.float32))
    return out.reshape(cout, N, Do, Ho, Wo)


def downsample_bn_final_sigmoid(x, w, b, gamma, beta, w_final, b_final):
    # d3 (Conv3d + BN + LeakyReLU) with the final 1x1 Conv3d + Sigmoid fused
    # into the same single pallas_call (no HBM round trip of the 32xM tensor).
    patches, (N, Do, Ho, Wo) = _im2col_T(x)
    K, M = patches.shape
    cout = w.shape[0]
    cf = w_final.shape[0]                                   # = 1
    out = pl.pallas_call(
        _conv_bn_lrelu_final_sigmoid_kernel,
        grid=(1,),
        in_specs=[_full_spec((K, M)),
                  _full_spec((cout, K)),
                  _full_spec((cout, 1)),
                  _full_spec((cout, 1)),
                  _full_spec((cout, 1)),
                  _full_spec((cf, cout)),
                  _full_spec((cf, 1))],
        out_specs=_full_spec((cf, M)),
        out_shape=jax.ShapeDtypeStruct((cf, M), jnp.float32),
        compiler_params=pltpu.CompilerParams(
            dimension_semantics=("arbitrary",),
            vmem_limit_bytes=_VMEM_LIMIT),
    )(patches,
      _weight_to_matrix_T(w).astype(jnp.bfloat16),
      b.reshape(cout, 1).astype(jnp.float32),
      gamma.reshape(cout, 1).astype(jnp.float32),
      beta.reshape(cout, 1).astype(jnp.float32),
      w_final.reshape(cf, cout).astype(jnp.float32),
      b_final.reshape(cf, 1).astype(jnp.float32))
    return out.reshape(cf, N, Do, Ho, Wo)


def patchgan_forward(x, y, params):
    # x, y: (N, C, D, H, W) as in the PyTorch module.  Cast to bf16 first,
    # then build the concatenated activation directly in channel-major
    # (C, N, D, H, W) order: the cast + layout shuffle + concat fuse into one
    # half-width pass (no separate f32 transpose of the concatenated tensor).
    xb = jnp.moveaxis(x.astype(jnp.bfloat16), 1, 0)
    yb = jnp.moveaxis(y.astype(jnp.bfloat16), 1, 0)
    h = jnp.concatenate([xb, yb], axis=0)                      # (C, N, D, H, W)
    h = downsample_no_bn(h, params["w1"], params["b1"])                    # d1
    h = downsample_bn(h, params["w2"], params["b2"],
                      params["g2"], params["bt2"])                         # d2
    o = downsample_bn_final_sigmoid(h, params["w3"], params["b3"],
                                    params["g3"], params["bt3"],
                                    params["w4"], params["b4"])  # d3+final+sig
    return jnp.transpose(o, (1, 0, 2, 3, 4))                  # -> (N,1,D,H,W)


# ------------------------------ parameter init --------------------------------
def init_params(key):
    def conv_init(k, cout, cin, kk):
        fan_in = cin * kk ** 3
        bound = 1.0 / (fan_in ** 0.5)
        kw_, kb_ = jax.random.split(k)
        w = jax.random.uniform(kw_, (cout, cin, kk, kk, kk), jnp.float32,
                               -bound, bound)
        b = jax.random.uniform(kb_, (cout,), jnp.float32, -bound, bound)
        return w, b

    ks = jax.random.split(key, 4)
    w1, b1 = conv_init(ks[0], 4, 4, 4)     # d1: Conv3d(4 -> 4, k=4)
    w2, b2 = conv_init(ks[1], 8, 4, 4)     # d2: Conv3d(4 -> 8, k=4)
    w3, b3 = conv_init(ks[2], 32, 8, 4)    # d3: Conv3d(8 -> 32, k=4)
    w4, b4 = conv_init(ks[3], 1, 32, 1)    # final: Conv3d(32 -> 1, k=1)
    return dict(
        w1=w1, b1=b1,
        w2=w2, b2=b2, g2=jnp.ones((8,), jnp.float32),
        bt2=jnp.zeros((8,), jnp.float32),
        w3=w3, b3=b3, g3=jnp.ones((32,), jnp.float32),
        bt3=jnp.zeros((32,), jnp.float32),
        w4=w4, b4=b4,
    )


if __name__ == "__main__":
    key = jax.random.PRNGKey(0)
    kx, ky, kp = jax.random.split(key, 3)
    # PatchGAN(input_channels=4): x and y each carry 2 channels (cat -> 4).
    x = jax.random.normal(kx, (2, 2, 16, 16, 16), jnp.float32)   # N,C,D,H,W
    y = jax.random.normal(ky, (2, 2, 16, 16, 16), jnp.float32)
    params = init_params(kp)

    out = jax.jit(patchgan_forward)(x, y, params)
    out = jax.block_until_ready(out)
    assert out.shape == (2, 1, 2, 2, 2), out.shape
    assert bool(jnp.all(jnp.isfinite(out)))
    assert bool(jnp.all((out > 0.0) & (out < 1.0)))
    print("KERNEL_OK")
</pallas_src>

<mosaic_0001>
module attributes {stable_mosaic.version = 11 : i64} {
  func.func @_gemm_bias_lrelu_kernel(%arg0: i32, %arg1: memref<256x1024xbf16, #tpu.memory_space<vmem>>, %arg2: memref<4x256xbf16, #tpu.memory_space<vmem>>, %arg3: memref<4x1xf32, #tpu.memory_space<vmem>>, %arg4: memref<4x1024xbf16, #tpu.memory_space<vmem>>) attributes {dimension_semantics = [#tpu.dimension_semantics<parallel>], iteration_bounds = array<i64: 1>, scalar_prefetch = 0 : i64, scratch_operands = 0 : i64, tpu.core_type = #tpu.core_type<tc>, window_params = [{transform_indices = @transform_0, window_bounds = array<i64: 256, 1024>}, {pipeline_mode = #tpu.pipeline_mode<synchronous>, transform_indices = @transform_1, window_bounds = array<i64: 4, 256>}, {pipeline_mode = #tpu.pipeline_mode<synchronous>, transform_indices = @transform_2, window_bounds = array<i64: 4, 1>}, {transform_indices = @transform_3, window_bounds = array<i64: 4, 1024>}]} {
    %c0 = arith.constant 0 : index
    %c0_0 = arith.constant 0 : index
    %0 = vector.load %arg2[%c0, %c0_0] : memref<4x256xbf16, #tpu.memory_space<vmem>>, vector<4x256xbf16>
    %c0_1 = arith.constant 0 : index
    %c0_2 = arith.constant 0 : index
    %1 = vector.load %arg1[%c0_1, %c0_2] : memref<256x1024xbf16, #tpu.memory_space<vmem>>, vector<256x1024xbf16>
    %cst = arith.constant dense<0.000000e+00> : vector<4x1024xf32>
    %2 = tpu.matmul %0, %1, %cst {dimension_numbers = #tpu.dot_dimension_numbers<[1], [0], [0], [1], [0, 0, 1, 1], [], []>} : vector<4x256xbf16>, vector<256x1024xbf16>, vector<4x1024xf32> -> vector<4x1024xf32>
    %c0_3 = arith.constant 0 : index
    %c0_4 = arith.constant 0 : index
    %3 = vector.load %arg3[%c0_3, %c0_4] : memref<4x1xf32, #tpu.memory_space<vmem>>, vector<4x1xf32>
    %4 = vector.broadcast %3 : vector<4x1xf32> to vector<4x1024xf32>
    %5 = arith.addf %2, %4 : vector<4x1024xf32>
    %cst_5 = arith.constant 0.000000e+00 : f32
    %6 = vector.broadcast %cst_5 : f32 to vector<4x1024xf32>
    %7 = arith.cmpf oge, %5, %6 : vector<4x1024xf32>
    %cst_6 = arith.constant 2.000000e-01 : f32
    %8 = vector.broadcast %cst_6 : f32 to vector<4x1024xf32>
    %9 = arith.mulf %8, %5 : vector<4x1024xf32>
    %10 = arith.select %7, %5, %9 : vector<4x1024xi1>, vector<4x1024xf32>
    %11 = arith.truncf %10 : vector<4x1024xf32> to vector<4x1024xbf16>
    %c0_7 = arith.constant 0 : index
    %c0_8 = arith.constant 0 : index
    %12 = vector.load %arg4[%c0_7, %c0_8] : memref<4x1024xbf16, #tpu.memory_space<vmem>>, vector<4x1024xbf16>
    tpu.vector_store %arg4[%c0_7, %c0_8], %11 {strides = array<i32>} : memref<4x1024xbf16, #tpu.memory_space<vmem>>, vector<4x1024xbf16>,
    return
  }
  func.func @transform_0(%arg0: i32) -> (i32, i32) {
    %c0_i32 = arith.constant 0 : i32
    %c0_i32_0 = arith.constant 0 : i32
    return %c0_i32, %arg0 : i32, i32
  }
  func.func @transform_1(%arg0: i32) -> (i32, i32) {
    %c0_i32 = arith.constant 0 : i32
    %c0_i32_0 = arith.constant 0 : i32
    %c0_i32_1 = arith.constant 0 : i32
    return %c0_i32, %c0_i32_0 : i32, i32
  }
  func.func @transform_2(%arg0: i32) -> (i32, i32) {
    %c0_i32 = arith.constant 0 : i32
    %c0_i32_0 = arith.constant 0 : i32
    %c0_i32_1 = arith.constant 0 : i32
    return %c0_i32, %c0_i32_0 : i32, i32
  }
  func.func @transform_3(%arg0: i32) -> (i32, i32) {
    %c0_i32 = arith.constant 0 : i32
    %c0_i32_0 = arith.constant 0 : i32
    return %c0_i32, %arg0 : i32, i32
  }
}

module attributes {stable_mosaic.version = 11 : i64} {
  func.func @_conv_bn_lrelu_kernel(%arg0: i32, %arg1: memref<256x128xbf16, #tpu.memory_space<vmem>>, %arg2: memref<8x256xbf16, #tpu.memory_space<vmem>>, %arg3: memref<8x1xf32, #tpu.memory_space<vmem>>, %arg4: memref<8x1xf32, #tpu.memory_space<vmem>>, %arg5: memref<8x1xf32, #tpu.memory_space<vmem>>, %arg6: memref<8x128xbf16, #tpu.memory_space<vmem>>) attributes {dimension_semantics = [#tpu.dimension_semantics<arbitrary>], iteration_bounds = array<i64: 1>, scalar_prefetch = 0 : i64, scratch_operands = 0 : i64, tpu.core_type = #tpu.core_type<tc>, window_params = [{pipeline_mode = #tpu.pipeline_mode<synchronous>, transform_indices = @transform_0, window_bounds = array<i64: 256, 128>}, {pipeline_mode = #tpu.pipeline_mode<synchronous>, transform_indices = @transform_1, window_bounds = array<i64: 8, 256>}, {pipeline_mode = #tpu.pipeline_mode<synchronous>, transform_indices = @transform_2, window_bounds = array<i64: 8, 1>}, {pipeline_mode = #tpu.pipeline_mode<synchronous>, transform_indices = @transform_3, window_bounds = array<i64: 8, 1>}, {pipeline_mode = #tpu.pipeline_mode<synchronous>, transform_indices = @transform_4, window_bounds = array<i64: 8, 1>}, {pipeline_mode = #tpu.pipeline_mode<synchronous>, transform_indices = @transform_5, window_bounds = array<i64: 8, 128>}]} {
    %c0 = arith.constant 0 : index
    %c0_0 = arith.constant 0 : index
    %0 = vector.load %arg2[%c0, %c0_0] : memref<8x256xbf16, #tpu.memory_space<vmem>>, vector<8x256xbf16>
    %c0_1 = arith.constant 0 : index
    %c0_2 = arith.constant 0 : index
    %1 = vector.load %arg1[%c0_1, %c0_2] : memref<256x128xbf16, #tpu.memory_space<vmem>>, vector<256x128xbf16>
    %cst = arith.constant dense<0.000000e+00> : vector<8x128xf32>
    %2 = tpu.matmul %0, %1, %cst {dimension_numbers = #tpu.dot_dimension_numbers<[1], [0], [0], [1], [0, 0, 1, 1], [], []>} : vector<8x256xbf16>, vector<256x128xbf16>, vector<8x128xf32> -> vector<8x128xf32>
    %c0_3 = arith.constant 0 : index
    %c0_4 = arith.constant 0 : index
    %3 = vector.load %arg3[%c0_3, %c0_4] : memref<8x1xf32, #tpu.memory_space<vmem>>, vector<8x1xf32>
    %4 = vector.broadcast %3 : vector<8x1xf32> to vector<8x128xf32>
    %5 = arith.addf %2, %4 : vector<8x128xf32>
    %cst_5 = arith.constant dense<0.000000e+00> : vector<8xf32>
    %6 = vector.multi_reduction <add>, %5, %cst_5 [1] : vector<8x128xf32> to vector<8xf32>
    %7 = vector.shape_cast %6 : vector<8xf32> to vector<8x1xf32>
    %cst_6 = arith.constant 1.280000e+02 : f32
    %8 = vector.broadcast %cst_6 : f32 to vector<8x1xf32>
    %9 = arith.divf %7, %8 : vector<8x1xf32>
    %10 = arith.mulf %5, %5 : vector<8x128xf32>
    %cst_7 = arith.constant dense<0.000000e+00> : vector<8xf32>
    %11 = vector.multi_reduction <add>, %10, %cst_7 [1] : vector<8x128xf32> to vector<8xf32>
    %12 = vector.shape_cast %11 : vector<8xf32> to vector<8x1xf32>
    %cst_8 = arith.constant 1.280000e+02 : f32
    %13 = vector.broadcast %cst_8 : f32 to vector<8x1xf32>
    %14 = arith.divf %12, %13 : vector<8x1xf32>
    %15 = arith.mulf %9, %9 : vector<8x1xf32>
    %16 = arith.subf %14, %15 : vector<8x1xf32>
    %cst_9 = arith.constant 0.000000e+00 : f32
    %17 = vector.broadcast %cst_9 : f32 to vector<8x1xf32>
    %18 = arith.maximumf %16, %17 : vector<8x1xf32>
    %c0_10 = arith.constant 0 : index
    %c0_11 = arith.constant 0 : index
    %19 = vector.load %arg4[%c0_10, %c0_11] : memref<8x1xf32, #tpu.memory_space<vmem>>, vector<8x1xf32>
    %cst_12 = arith.constant 9.99999974E-6 : f32
    %20 = vector.broadcast %cst_12 : f32 to vector<8x1xf32>
    %21 = arith.addf %18, %20 : vector<8x1xf32>
    %22 = math.rsqrt %21 : vector<8x1xf32>
    %23 = arith.mulf %19, %22 : vector<8x1xf32>
    %c0_13 = arith.constant 0 : index
    %c0_14 = arith.constant 0 : index
    %24 = vector.load %arg5[%c0_13, %c0_14] : memref<8x1xf32, #tpu.memory_space<vmem>>, vector<8x1xf32>
    %25 = arith.mulf %9, %23 : vector<8x1xf32>
    %26 = arith.subf %24, %25 : vector<8x1xf32>
    %27 = vector.broadcast %23 : vector<8x1xf32> to vector<8x128xf32>
    %28 = arith.mulf %5, %27 : vector<8x128xf32>
    %29 = vector.broadcast %26 : vector<8x1xf32> to vector<8x128xf32>
    %30 = arith.addf %28, %29 : vector<8x128xf32>
    %cst_15 = arith.constant 0.000000e+00 : f32
    %31 = vector.broadcast %cst_15 : f32 to vector<8x128xf32>
    %32 = arith.cmpf oge, %30, %31 : vector<8x128xf32>
    %cst_16 = arith.constant 2.000000e-01 : f32
    %33 = vector.broadcast %cst_16 : f32 to vector<8x128xf32>
    %34 = arith.mulf %33, %30 : vector<8x128xf32>
    %35 = arith.select %32, %30, %34 : vector<8x128xi1>, vector<8x128xf32>
    %36 = arith.truncf %35 : vector<8x128xf32> to vector<8x128xbf16>
    %c0_17 = arith.constant 0 : index
    %c0_18 = arith.constant 0 : index
    %37 = vector.load %arg6[%c0_17, %c0_18] : memref<8x128xbf16, #tpu.memory_space<vmem>>, vector<8x128xbf16>
    tpu.vector_store %arg6[%c0_17, %c0_18], %36 {strides = array<i32>} : memref<8x128xbf16, #tpu.memory_space<vmem>>, vector<8x128xbf16>,
    return
  }
  func.func @transform_0(%arg0: i32) -> (i32, i32) {
    %c0_i32 = arith.constant 0 : i32
    %c0_i32_0 = arith.constant 0 : i32
    %c0_i32_1 = arith.constant 0 : i32
    return %c0_i32, %c0_i32_0 : i32, i32
  }
  func.func @transform_1(%arg0: i32) -> (i32, i32) {
    %c0_i32 = arith.constant 0 : i32
    %c0_i32_0 = arith.constant 0 : i32
    %c0_i32_1 = arith.constant 0 : i32
    return %c0_i32, %c0_i32_0 : i32, i32
  }
  func.func @transform_2(%arg0: i32) -> (i32, i32) {
    %c0_i32 = arith.constant 0 : i32
    %c0_i32_0 = arith.constant 0 : i32
    %c0_i32_1 = arith.constant 0 : i32
    return %c0_i32, %c0_i32_0 : i32, i32
  }
  func.func @transform_3(%arg0: i32) -> (i32, i32) {
    %c0_i32 = arith.constant 0 : i32
    %c0_i32_0 = arith.constant 0 : i32
    %c0_i32_1 = arith.constant 0 : i32
    return %c0_i32, %c0_i32_0 : i32, i32
  }
  func.func @transform_4(%arg0: i32) -> (i32, i32) {
    %c0_i32 = arith.constant 0 : i32
    %c0_i32_0 = arith.constant 0 : i32
    %c0_i32_1 = arith.constant 0 : i32
    return %c0_i32, %c0_i32_0 : i32, i32
  }
  func.func @transform_5(%arg0: i32) -> (i32, i32) {
    %c0_i32 = arith.constant 0 : i32
    %c0_i32_0 = arith.constant 0 : i32
    %c0_i32_1 = arith.constant 0 : i32
    return %c0_i32, %c0_i32_0 : i32, i32
  }
}

module attributes {stable_mosaic.version = 11 : i64} {
  func.func @_conv_bn_lrelu_final_sigmoid_kernel(%arg0: i32, %arg1: memref<512x16xbf16, #tpu.memory_space<vmem>>, %arg2: memref<32x512xbf16, #tpu.memory_space<vmem>>, %arg3: memref<32x1xf32, #tpu.memory_space<vmem>>, %arg4: memref<32x1xf32, #tpu.memory_space<vmem>>, %arg5: memref<32x1xf32, #tpu.memory_space<vmem>>, %arg6: memref<1x32xf32, #tpu.memory_space<vmem>>, %arg7: memref<1x1xf32, #tpu.memory_space<vmem>>, %arg8: memref<1x16xf32, #tpu.memory_space<vmem>>) attributes {dimension_semantics = [#tpu.dimension_semantics<arbitrary>], iteration_bounds = array<i64: 1>, scalar_prefetch = 0 : i64, scratch_operands = 0 : i64, tpu.core_type = #tpu.core_type<tc>, window_params = [{pipeline_mode = #tpu.pipeline_mode<synchronous>, transform_indices = @transform_0, window_bounds = array<i64: 512, 16>}, {pipeline_mode = #tpu.pipeline_mode<synchronous>, transform_indices = @transform_1, window_bounds = array<i64: 32, 512>}, {pipeline_mode = #tpu.pipeline_mode<synchronous>, transform_indices = @transform_2, window_bounds = array<i64: 32, 1>}, {pipeline_mode = #tpu.pipeline_mode<synchronous>, transform_indices = @transform_3, window_bounds = array<i64: 32, 1>}, {pipeline_mode = #tpu.pipeline_mode<synchronous>, transform_indices = @transform_4, window_bounds = array<i64: 32, 1>}, {pipeline_mode = #tpu.pipeline_mode<synchronous>, transform_indices = @transform_5, window_bounds = array<i64: 1, 32>}, {pipeline_mode = #tpu.pipeline_mode<synchronous>, transform_indices = @transform_6, window_bounds = array<i64: 1, 1>}, {pipeline_mode = #tpu.pipeline_mode<synchronous>, transform_indices = @transform_7, window_bounds = array<i64: 1, 16>}]} {
    %c0 = arith.constant 0 : index
    %c0_0 = arith.constant 0 : index
    %0 = vector.load %arg2[%c0, %c0_0] : memref<32x512xbf16, #tpu.memory_space<vmem>>, vector<32x512xbf16>
    %c0_1 = arith.constant 0 : index
    %c0_2 = arith.constant 0 : index
    %1 = vector.load %arg1[%c0_1, %c0_2] : memref<512x16xbf16, #tpu.memory_space<vmem>>, vector<512x16xbf16>
    %cst = arith.constant dense<0.000000e+00> : vector<32x16xf32>
    %2 = tpu.matmul %0, %1, %cst {dimension_numbers = #tpu.dot_dimension_numbers<[1], [0], [0], [1], [0, 0, 1, 1], [], []>} : vector<32x512xbf16>, vector<512x16xbf16>, vector<32x16xf32> -> vector<32x16xf32>
    %c0_3 = arith.constant 0 : index
    %c0_4 = arith.constant 0 : index
    %3 = vector.load %arg3[%c0_3, %c0_4] : memref<32x1xf32, #tpu.memory_space<vmem>>, vector<32x1xf32>
    %4 = vector.broadcast %3 : vector<32x1xf32> to vector<32x16xf32>
    %5 = arith.addf %2, %4 : vector<32x16xf32>
    %cst_5 = arith.constant dense<0.000000e+00> : vector<32xf32>
    %6 = vector.multi_reduction <add>, %5, %cst_5 [1] : vector<32x16xf32> to vector<32xf32>
    %7 = vector.shape_cast %6 : vector<32xf32> to vector<32x1xf32>
    %cst_6 = arith.constant 1.600000e+01 : f32
    %8 = vector.broadcast %cst_6 : f32 to vector<32x1xf32>
    %9 = arith.divf %7, %8 : vector<32x1xf32>
    %10 = arith.mulf %5, %5 : vector<32x16xf32>
    %cst_7 = arith.constant dense<0.000000e+00> : vector<32xf32>
    %11 = vector.multi_reduction <add>, %10, %cst_7 [1] : vector<32x16xf32> to vector<32xf32>
    %12 = vector.shape_cast %11 : vector<32xf32> to vector<32x1xf32>
    %cst_8 = arith.constant 1.600000e+01 : f32
    %13 = vector.broadcast %cst_8 : f32 to vector<32x1xf32>
    %14 = arith.divf %12, %13 : vector<32x1xf32>
    %15 = arith.mulf %9, %9 : vector<32x1xf32>
    %16 = arith.subf %14, %15 : vector<32x1xf32>
    %cst_9 = arith.constant 0.000000e+00 : f32
    %17 = vector.broadcast %cst_9 : f32 to vector<32x1xf32>
    %18 = arith.maximumf %16, %17 : vector<32x1xf32>
    %c0_10 = arith.constant 0 : index
    %c0_11 = arith.constant 0 : index
    %19 = vector.load %arg4[%c0_10, %c0_11] : memref<32x1xf32, #tpu.memory_space<vmem>>, vector<32x1xf32>
    %cst_12 = arith.constant 9.99999974E-6 : f32
    %20 = vector.broadcast %cst_12 : f32 to vector<32x1xf32>
    %21 = arith.addf %18, %20 : vector<32x1xf32>
    %22 = math.rsqrt %21 : vector<32x1xf32>
    %23 = arith.mulf %19, %22 : vector<32x1xf32>
    %c0_13 = arith.constant 0 : index
    %c0_14 = arith.constant 0 : index
    %24 = vector.load %arg5[%c0_13, %c0_14] : memref<32x1xf32, #tpu.memory_space<vmem>>, vector<32x1xf32>
    %25 = arith.mulf %9, %23 : vector<32x1xf32>
    %26 = arith.subf %24, %25 : vector<32x1xf32>
    %27 = vector.broadcast %23 : vector<32x1xf32> to vector<32x16xf32>
    %28 = arith.mulf %5, %27 : vector<32x16xf32>
    %29 = vector.broadcast %26 : vector<32x1xf32> to vector<32x16xf32>
    %30 = arith.addf %28, %29 : vector<32x16xf32>
    %cst_15 = arith.constant 0.000000e+00 : f32
    %31 = vector.broadcast %cst_15 : f32 to vector<32x16xf32>
    %32 = arith.cmpf oge, %30, %31 : vector<32x16xf32>
    %cst_16 = arith.constant 2.000000e-01 : f32
    %33 = vector.broadcast %cst_16 : f32 to vector<32x16xf32>
    %34 = arith.mulf %33, %30 : vector<32x16xf32>
    %35 = arith.select %32, %30, %34 : vector<32x16xi1>, vector<32x16xf32>
    %c0_17 = arith.constant 0 : index
    %c0_18 = arith.constant 0 : index
    %36 = vector.load %arg6[%c0_17, %c0_18] : memref<1x32xf32, #tpu.memory_space<vmem>>, vector<1x32xf32>
    %cst_19 = arith.constant dense<0.000000e+00> : vector<1x16xf32>
    %37 = tpu.matmul %36, %35, %cst_19 {dimension_numbers = #tpu.dot_dimension_numbers<[1], [0], [0], [1], [0, 0, 1, 1], [], []>} : vector<1x32xf32>, vector<32x16xf32>, vector<1x16xf32> -> vector<1x16xf32>
    %c0_20 = arith.constant 0 : index
    %c0_21 = arith.constant 0 : index
    %38 = vector.load %arg7[%c0_20, %c0_21] : memref<1x1xf32, #tpu.memory_space<vmem>>, vector<1x1xf32>
    %39 = vector.broadcast %38 : vector<1x1xf32> to vector<1x16xf32>
    %40 = arith.addf %37, %39 : vector<1x16xf32>
    %cst_22 = arith.constant 0.000000e+00 : f32
    %41 = vector.broadcast %cst_22 : f32 to vector<1x16xf32>
    %42 = arith.subf %41, %40 : vector<1x16xf32>
    %43 = math.exp %42 : vector<1x16xf32>
    %cst_23 = arith.constant 1.000000e+00 : f32
    %44 = vector.broadcast %cst_23 : f32 to vector<1x16xf32>
    %45 = arith.addf %44, %43 : vector<1x16xf32>
    %cst_24 = arith.constant 1.000000e+00 : f32
    %46 = vector.broadcast %cst_24 : f32 to vector<1x16xf32>
    %47 = arith.divf %46, %45 : vector<1x16xf32>
    %c0_25 = arith.constant 0 : index
    %c0_26 = arith.constant 0 : index
    %48 = vector.load %arg8[%c0_25, %c0_26] : memref<1x16xf32, #tpu.memory_space<vmem>>, vector<1x16xf32>
    tpu.vector_store %arg8[%c0_25, %c0_26], %47 {strides = array<i32>} : memref<1x16xf32, #tpu.memory_space<vmem>>, vector<1x16xf32>,
    return
  }
  func.func @transform_0(%arg0: i32) -> (i32, i32) {
    %c0_i32 = arith.constant 0 : i32
    %c0_i32_0 = arith.constant 0 : i32
    %c0_i32_1 = arith.constant 0 : i32
    return %c0_i32, %c0_i32_0 : i32, i32
  }
  func.func @transform_1(%arg0: i32) -> (i32, i32) {
    %c0_i32 = arith.constant 0 : i32
    %c0_i32_0 = arith.constant 0 : i32
    %c0_i32_1 = arith.constant 0 : i32
    return %c0_i32, %c0_i32_0 : i32, i32
  }
  func.func @transform_2(%arg0: i32) -> (i32, i32) {
    %c0_i32 = arith.constant 0 : i32
    %c0_i32_0 = arith.constant 0 : i32
    %c0_i32_1 = arith.constant 0 : i32
    return %c0_i32, %c0_i32_0 : i32, i32
  }
  func.func @transform_3(%arg0: i32) -> (i32, i32) {
    %c0_i32 = arith.constant 0 : i32
    %c0_i32_0 = arith.constant 0 : i32
    %c0_i32_1 = arith.constant 0 : i32
    return %c0_i32, %c0_i32_0 : i32, i32
  }
  func.func @transform_4(%arg0: i32) -> (i32, i32) {
    %c0_i32 = arith.constant 0 : i32
    %c0_i32_0 = arith.constant 0 : i32
    %c0_i32_1 = arith.constant 0 : i32
    return %c0_i32, %c0_i32_0 : i32, i32
  }
  func.func @transform_5(%arg0: i32) -> (i32, i32) {
    %c0_i32 = arith.constant 0 : i32
    %c0_i32_0 = arith.constant 0 : i32
    %c0_i32_1 = arith.constant 0 : i32
    return %c0_i32, %c0_i32_0 : i32, i32
  }
  func.func @transform_6(%arg0: i32) -> (i32, i32) {
    %c0_i32 = arith.constant 0 : i32
    %c0_i32_0 = arith.constant 0 : i32
    %c0_i32_1 = arith.constant 0 : i32
    return %c0_i32, %c0_i32_0 : i32, i32
  }
  func.func @transform_7(%arg0: i32) -> (i32, i32) {
    %c0_i32 = arith.constant 0 : i32
    %c0_i32_0 = arith.constant 0 : i32
    %c0_i32_1 = arith.constant 0 : i32
    return %c0_i32, %c0_i32_0 : i32, i32
  }
}

</mosaic_0001>

<bundles_post_ra>
// kernel: patchgan_forward.3
= control target key start
LH: loop header
LB: loop body
LE: loop exit
PB: predicated region body
PF: predicated region fallthrough
CT: control target
= control target key end

     0   :  { %v1182_v26 = vmov 0   ;;  %s1614_s0 = inlined_call_operand.vmem [shape: bf16[256,1024], index: 0, kind: input, shape index: {}]   ;;  %s1615_s1 = inlined_call_operand.vmem [shape: bf16[4,256], index: 1, kind: input, shape index: {}]   ;;  %s1616_s2 = inlined_call_operand.vmem [shape: f32[4,1], index: 2, kind: input, shape index: {}]   ;;  %s1617_s3 = inlined_call_operand.vmem [shape: bf16[4,1024], index: 3, kind: output, shape index: {}]  }
   0x1   :  { %v15_v0 = vld [vmem:[%s1614_s0] sm:$0xff]  ;;  %v16_v2 = vld [vmem:[%s1614_s0 + $0x8] sm:$0xff]  ;;  %1181 = vset.pattern.permute.xlu0 %v1182_v26 }
   0x2   :  { %v19_v1 = vld [vmem:[%s1614_s0 + $0x20] sm:$0xff]  ;;  %v20_v4 = vld [vmem:[%s1614_s0 + $0x28] sm:$0xff] }
   0x3   :  { %v1048_v3 = vcombine.high %v15_v0, %v19_v1  ;;  %v1047_v5 = vcombine.low %v15_v0, %v19_v1  ;;  %v23_v6 = vld [vmem:[%s1614_s0 + $0x40] sm:$0xff]  ;;  %v1050_v8 = vcombine.high %v16_v2, %v20_v4  ;;  %v1049_v9 = vcombine.low %v16_v2, %v20_v4  ;;  %v24_v11 = vld [vmem:[%s1614_s0 + $0x48] sm:$0xff] }
   0x4   :  { %v27_v7 = vld [vmem:[%s1614_s0 + $0x60] sm:$0xff]  ;;  %v28_v12 = vld [vmem:[%s1614_s0 + $0x68] sm:$0xff] }
   0x5   :  { %v1056_v10 = vcombine.high %v23_v6, %v27_v7  ;;  %v31_v13 = vld [vmem:[%s1614_s0 + $0x80] sm:$0xff]  ;;  %800 = vmatprep.subr.bf16.mxu0 %v1048_v3  ;;  %v1058_v14 = vcombine.high %v24_v11, %v28_v12  ;;  %v32_v16 = vld [vmem:[%s1614_s0 + $0x88] sm:$0xff]  ;;  %841 = vmatprep.subr.bf16.mxu1 %v1050_v8  ;;  %v1055_v18 = vcombine.low %v23_v6, %v27_v7 }
   0x6   :  { %v35_v15 = vld [vmem:[%s1614_s0 + $0xa0] sm:$0xff]  ;;  %v36_v17 = vld [vmem:[%s1614_s0 + $0xa8] sm:$0xff]  ;;  %801 = vmatpush1.bf16.msra.mxu0 %v1047_v5  ;;  %842 = vmatpush1.bf16.msra.mxu1 %v1049_v9  ;;  %v1057_v19 = vcombine.low %v24_v11, %v28_v12 }
   0x7   :  { %802 = vmatprep.subr.bf16.mxu0 %v1056_v10  ;;  %v1064_v20 = vcombine.high %v31_v13, %v35_v15  ;;  %843 = vmatprep.subr.bf16.mxu1 %v1058_v14  ;;  %v1066_v21 = vcombine.high %v32_v16, %v36_v17  ;;  %v39_v22 = vld [vmem:[%s1614_s0 + $0xc0] sm:$0xff]  ;;  %v40_v24 = vld [vmem:[%s1614_s0 + $0xc8] sm:$0xff]  ;;  %v1063_v27 = vcombine.low %v31_v13, %v35_v15 }
   0x8   :  { %v43_v23 = vld [vmem:[%s1614_s0 + $0xe0] sm:$0xff]  ;;  %v44_v25 = vld [vmem:[%s1614_s0 + $0xe8] sm:$0xff]  ;;  %v1065_v28 = vcombine.low %v32_v16, %v36_v17 }
   0x9   :  { %v1072_v29 = vcombine.high %v39_v22, %v43_v23  ;;  %v1074_v30 = vcombine.high %v40_v24, %v44_v25  ;;  %v47_v31 = vld [vmem:[%s1614_s0 + $0x100] sm:$0xff]  ;;  %v48_v33 = vld [vmem:[%s1614_s0 + $0x108] sm:$0xff]  ;;  %v1071_v35 = vcombine.low %v39_v22, %v43_v23  ;;  %v1073_v36 = vcombine.low %v40_v24, %v44_v25 }
   0xa   :  { %803 = vmatpush1.bf16.msra.mxu0 %v1055_v18  ;;  %844 = vmatpush1.bf16.msra.mxu1 %v1057_v19  ;;  %v51_v32 = vld [vmem:[%s1614_s0 + $0x120] sm:$0xff]  ;;  %v52_v34 = vld [vmem:[%s1614_s0 + $0x128] sm:$0xff] }
   0xb   :  { %804 = vmatprep.subr.bf16.mxu0 %v1064_v20  ;;  %845 = vmatprep.subr.bf16.mxu1 %v1066_v21  ;;  %v1080_v37 = vcombine.high %v47_v31, %v51_v32  ;;  %v1082_v38 = vcombine.high %v48_v33, %v52_v34  ;;  %v55_v39 = vld [vmem:[%s1614_s0 + $0x140] sm:$0xff]  ;;  %v56_v41 = vld [vmem:[%s1614_s0 + $0x148] sm:$0xff]  ;;  %v1079_v43 = vcombine.low %v47_v31, %v51_v32 }
   0xc   :  { %v59_v40 = vld [vmem:[%s1614_s0 + $0x160] sm:$0xff]  ;;  %v60_v42 = vld [vmem:[%s1614_s0 + $0x168] sm:$0xff]  ;;  %v1081_v44 = vcombine.low %v48_v33, %v52_v34 }
   0xd   :  { %v1088_v45 = vcombine.high %v55_v39, %v59_v40  ;;  %v1090_v46 = vcombine.high %v56_v41, %v60_v42  ;;  %v63_v47 = vld [vmem:[%s1614_s0 + $0x180] sm:$0xff]  ;;  %v64_v49 = vld [vmem:[%s1614_s0 + $0x188] sm:$0xff]  ;;  %v1087_v51 = vcombine.low %v55_v39, %v59_v40  ;;  %v1089_v52 = vcombine.low %v56_v41, %v60_v42 }
   0xe   :  { %805 = vmatpush1.bf16.msra.mxu0 %v1063_v27  ;;  %846 = vmatpush1.bf16.msra.mxu1 %v1065_v28  ;;  %v67_v48 = vld [vmem:[%s1614_s0 + $0x1a0] sm:$0xff]  ;;  %v68_v50 = vld [vmem:[%s1614_s0 + $0x1a8] sm:$0xff] }
   0xf   :  { %806 = vmatprep.subr.bf16.mxu0 %v1072_v29  ;;  %847 = vmatprep.subr.bf16.mxu1 %v1074_v30  ;;  %v1096_v53 = vcombine.high %v63_v47, %v67_v48  ;;  %v1291_v54 = vld.sshfl [vmem:[%s1615_s1] sm:$0x33 pattern:$0x76325410]  ;;  %v1098_v55 = vcombine.high %v64_v49, %v68_v50  ;;  %v72_v59 = vld [vmem:[%s1614_s0 + $0x1c8] sm:$0xff]  ;;  %v1095_v61 = vcombine.low %v63_v47, %v67_v48 }
  0x10   :  { %v71_v56 = vld [vmem:[%s1614_s0 + $0x1c0] sm:$0xff]  ;;  %v1301_v58 = vcombine.high %v1291_v54, %v1291_v54  ;;  %v76_v60 = vld [vmem:[%s1614_s0 + $0x1e8] sm:$0xff]  ;;  %v1097_v62 = vcombine.low %v64_v49, %v68_v50 }
  0x11   :  { %v75_v57 = vld [vmem:[%s1614_s0 + $0x1e0] sm:$0xff]  ;;  %v1106_v0 = vcombine.high %v72_v59, %v76_v60  ;;  %v80_v3 = vld [vmem:[%s1614_s0 + $0x208] sm:$0xff]  ;;  %v1105_v6 = vcombine.low %v72_v59, %v76_v60 }
  0x12   :  { %807 = vmatpush1.bf16.msra.mxu0 %v1071_v35  ;;  %848 = vmatpush1.bf16.msra.mxu1 %v1073_v36  ;;  %v1104_v63 = vcombine.high %v71_v56, %v75_v57  ;;  %v79_v1 = vld [vmem:[%s1614_s0 + $0x200] sm:$0xff]  ;;  %v84_v4 = vld [vmem:[%s1614_s0 + $0x228] sm:$0xff]  ;;  %v1103_v5 = vcombine.low %v71_v56, %v75_v57 }
  0x13   :  { %808 = vmatprep.subr.bf16.mxu0 %v1080_v37  ;;  %849 = vmatprep.subr.bf16.mxu1 %v1082_v38  ;;  %v83_v2 = vld [vmem:[%s1614_s0 + $0x220] sm:$0xff]  ;;  %v1114_v8 = vcombine.high %v80_v3, %v84_v4  ;;  %v88_v11 = vld [vmem:[%s1614_s0 + $0x248] sm:$0xff]  ;;  %v1113_v14 = vcombine.low %v80_v3, %v84_v4  ;;  %v17_v4 = vld [vmem:[%s1614_s0 + $0x10] sm:$0xff] }
  0x14   :  { %832 = vmatprep.mubr.bf16.mxu0 %v1301_v58  ;;  %873 = vmatprep.mubr.bf16.mxu1 %v1301_v58  ;;  %v1112_v7 = vcombine.high %v79_v1, %v83_v2  ;;  %v87_v9 = vld [vmem:[%s1614_s0 + $0x240] sm:$0xff]  ;;  %v92_v12 = vld [vmem:[%s1614_s0 + $0x268] sm:$0xff]  ;;  %v1111_v13 = vcombine.low %v79_v1, %v83_v2 }
  0x15   :  { %v91_v10 = vld [vmem:[%s1614_s0 + $0x260] sm:$0xff]  ;;  %v1122_v16 = vcombine.high %v88_v11, %v92_v12  ;;  %v96_v19 = vld [vmem:[%s1614_s0 + $0x288] sm:$0xff]  ;;  %v1121_v22 = vcombine.low %v88_v11, %v92_v12  ;;  %v25_v12 = vld [vmem:[%s1614_s0 + $0x50] sm:$0xff] }
  0x16   :  { %809 = vmatpush1.bf16.msra.mxu0 %v1079_v43  ;;  %850 = vmatpush1.bf16.msra.mxu1 %v1081_v44  ;;  %v1120_v15 = vcombine.high %v87_v9, %v91_v10  ;;  %v95_v17 = vld [vmem:[%s1614_s0 + $0x280] sm:$0xff]  ;;  %v100_v20 = vld [vmem:[%s1614_s0 + $0x2a8] sm:$0xff]  ;;  %v1119_v21 = vcombine.low %v87_v9, %v91_v10 }
  0x17   :  { %810 = vmatprep.subr.bf16.mxu0 %v1088_v45  ;;  %851 = vmatprep.subr.bf16.mxu1 %v1090_v46  ;;  %v99_v18 = vld [vmem:[%s1614_s0 + $0x2a0] sm:$0xff]  ;;  %v1130_v24 = vcombine.high %v96_v19, %v100_v20  ;;  %v104_v27 = vld [vmem:[%s1614_s0 + $0x2c8] sm:$0xff]  ;;  %v1129_v30 = vcombine.low %v96_v19, %v100_v20  ;;  %v33_v20 = vld [vmem:[%s1614_s0 + $0x90] sm:$0xff] }
  0x18   :  { %v1128_v23 = vcombine.high %v95_v17, %v99_v18  ;;  %v103_v25 = vld [vmem:[%s1614_s0 + $0x2c0] sm:$0xff]  ;;  %v108_v28 = vld [vmem:[%s1614_s0 + $0x2e8] sm:$0xff]  ;;  %v1127_v29 = vcombine.low %v95_v17, %v99_v18 }
  0x19   :  { %v107_v26 = vld [vmem:[%s1614_s0 + $0x2e0] sm:$0xff]  ;;  %v1138_v32 = vcombine.high %v104_v27, %v108_v28  ;;  %v112_v35 = vld [vmem:[%s1614_s0 + $0x308] sm:$0xff]  ;;  %v1137_v39 = vcombine.low %v104_v27, %v108_v28  ;;  %v41_v28 = vld [vmem:[%s1614_s0 + $0xd0] sm:$0xff] }
  0x1a   :  { %811 = vmatpush1.bf16.msra.mxu0 %v1087_v51  ;;  %852 = vmatpush1.bf16.msra.mxu1 %v1089_v52  ;;  %v1136_v31 = vcombine.high %v103_v25, %v107_v26  ;;  %v111_v33 = vld [vmem:[%s1614_s0 + $0x300] sm:$0xff]  ;;  %v116_v36 = vld [vmem:[%s1614_s0 + $0x328] sm:$0xff]  ;;  %v1135_v38 = vcombine.low %v103_v25, %v107_v26 }
  0x1b   :  { %812 = vmatprep.subr.bf16.mxu0 %v1096_v53  ;;  %853 = vmatprep.subr.bf16.mxu1 %v1098_v55  ;;  %v115_v34 = vld [vmem:[%s1614_s0 + $0x320] sm:$0xff]  ;;  %v1146_v41 = vcombine.high %v112_v35, %v116_v36  ;;  %v120_v44 = vld [vmem:[%s1614_s0 + $0x348] sm:$0xff]  ;;  %v1145_v47 = vcombine.low %v112_v35, %v116_v36  ;;  %v49_v36 = vld [vmem:[%s1614_s0 + $0x110] sm:$0xff] }
  0x1c   :  { %v143_v37 = vld [vmem:[%s1616_s2] sm:$0xf]  ;;  %v1144_v40 = vcombine.high %v111_v33, %v115_v34  ;;  %v124_v45 = vld [vmem:[%s1614_s0 + $0x368] sm:$0xff]  ;;  %v1143_v46 = vcombine.low %v111_v33, %v115_v34 }
  0x1d   :  { %146 = vperm.xlu0 %1181, %v143_v37   ;;  %v119_v42 = vld [vmem:[%s1614_s0 + $0x340] sm:$0xff]  ;;  %v1154_v49 = vcombine.high %v120_v44, %v124_v45  ;;  %v128_v52 = vld [vmem:[%s1614_s0 + $0x388] sm:$0xff]  ;;  %v1153_v56 = vcombine.low %v120_v44, %v124_v45  ;;  %v53_v37 = vld [vmem:[%s1614_s0 + $0x130] sm:$0xff] }
  0x1e   :  { %813 = vmatpush1.bf16.msra.mxu0 %v1095_v61  ;;  %854 = vmatpush1.bf16.msra.mxu1 %v1097_v62  ;;  %v123_v43 = vld [vmem:[%s1614_s0 + $0x360] sm:$0xff]  ;;  %v132_v53 = vld [vmem:[%s1614_s0 + $0x3a8] sm:$0xff]  ;;  %v61_v44 = vld [vmem:[%s1614_s0 + $0x170] sm:$0xff] }
  0x1f   :  { %814 = vmatprep.subr.bf16.mxu0 %v1104_v63  ;;  %855 = vmatprep.subr.bf16.mxu1 %v1106_v0  ;;  %v1152_v48 = vcombine.high %v119_v42, %v123_v43  ;;  %v127_v50 = vld [vmem:[%s1614_s0 + $0x380] sm:$0xff]  ;;  %v1151_v55 = vcombine.low %v119_v42, %v123_v43  ;;  %v1162_v59 = vcombine.high %v128_v52, %v132_v53  ;;  %v136_v62 = vld [vmem:[%s1614_s0 + $0x3c8] sm:$0xff]  ;;  %v57_v43 = vld [vmem:[%s1614_s0 + $0x150] sm:$0xff] }
  0x20   :  { %v131_v51 = vld [vmem:[%s1614_s0 + $0x3a0] sm:$0xff]  ;;  %v140_v63 = vld [vmem:[%s1614_s0 + $0x3e8] sm:$0xff]  ;;  %v1161_v1 = vcombine.low %v128_v52, %v132_v53  ;;  %v58_v45 = vld [vmem:[%s1614_s0 + $0x158] sm:$0xff] }
  0x21   :  { %v1160_v57 = vcombine.high %v127_v50, %v131_v51  ;;  %v135_v60 = vld [vmem:[%s1614_s0 + $0x3c0] sm:$0xff]  ;;  %v1159_v0 = vcombine.low %v127_v50, %v131_v51  ;;  %v1170_v3 = vcombine.high %v136_v62, %v140_v63  ;;  %v1169_v9 = vcombine.low %v136_v62, %v140_v63  ;;  %v65_v51 = vld [vmem:[%s1614_s0 + $0x190] sm:$0xff]  ;;  %v66_v53 = vld [vmem:[%s1614_s0 + $0x198] sm:$0xff] }
  0x22   :  { %815 = vmatpush1.bf16.msra.mxu0 %v1103_v5  ;;  %856 = vmatpush1.bf16.msra.mxu1 %v1105_v6  ;;  %v139_v61 = vld [vmem:[%s1614_s0 + $0x3e0] sm:$0xff]  ;;  %v21_v5 = vld [vmem:[%s1614_s0 + $0x30] sm:$0xff]  ;;  %v18_v6 = vld [vmem:[%s1614_s0 + $0x18] sm:$0xff] }
  0x23   :  { %816 = vmatprep.subr.bf16.mxu0 %v1112_v7  ;;  %857 = vmatprep.subr.bf16.mxu1 %v1114_v8  ;;  %v1168_v2 = vcombine.high %v135_v60, %v139_v61  ;;  %v22_v7 = vld [vmem:[%s1614_s0 + $0x38] sm:$0xff]  ;;  %v1167_v8 = vcombine.low %v135_v60, %v139_v61  ;;  %v1052_v10 = vcombine.high %v17_v4, %v21_v5  ;;  %v69_v52 = vld [vmem:[%s1614_s0 + $0x1b0] sm:$0xff] }
  0x24   :  { %v1054_v11 = vcombine.high %v18_v6, %v22_v7  ;;  %v1053_v17 = vcombine.low %v18_v6, %v22_v7  ;;  %v73_v61 = vld [vmem:[%s1614_s0 + $0x1d0] sm:$0xff]  ;;  %v74_v63 = vld [vmem:[%s1614_s0 + $0x1d8] sm:$0xff] }
  0x25   :  { %v77_v62 = vld [vmem:[%s1614_s0 + $0x1f0] sm:$0xff]  ;;  %v82_v7 = vld [vmem:[%s1614_s0 + $0x218] sm:$0xff] }
  0x26   :  { %817 = vmatpush1.bf16.msra.mxu0 %v1111_v13  ;;  %858 = vmatpush1.bf16.msra.mxu1 %v1113_v14  ;;  %v29_v13 = vld [vmem:[%s1614_s0 + $0x70] sm:$0xff]  ;;  %v26_v14 = vld [vmem:[%s1614_s0 + $0x58] sm:$0xff] }
  0x27   :  { %818 = vmatprep.subr.bf16.mxu0 %v1120_v15  ;;  %859 = vmatprep.subr.bf16.mxu1 %v1122_v16  ;;  %v30_v15 = vld [vmem:[%s1614_s0 + $0x78] sm:$0xff]  ;;  %v1051_v16 = vcombine.low %v17_v4, %v21_v5  ;;  %v1060_v18 = vcombine.high %v25_v12, %v29_v13  ;;  %v81_v5 = vld [vmem:[%s1614_s0 + $0x210] sm:$0xff] }
  0x28   :  { %v1062_v19 = vcombine.high %v26_v14, %v30_v15  ;;  %v1061_v25 = vcombine.low %v26_v14, %v30_v15  ;;  %v85_v6 = vld [vmem:[%s1614_s0 + $0x230] sm:$0xff]  ;;  %v90_v15 = vld [vmem:[%s1614_s0 + $0x258] sm:$0xff] }
  0x29   :  { %v93_v14 = vld [vmem:[%s1614_s0 + $0x270] sm:$0xff] }
  0x2a   :  { %819 = vmatpush1.bf16.msra.mxu0 %v1119_v21  ;;  %860 = vmatpush1.bf16.msra.mxu1 %v1121_v22  ;;  %v37_v21 = vld [vmem:[%s1614_s0 + $0xb0] sm:$0xff]  ;;  %v34_v22 = vld [vmem:[%s1614_s0 + $0x98] sm:$0xff] }
  0x2b   :  { %820 = vmatprep.subr.bf16.mxu0 %v1128_v23  ;;  %861 = vmatprep.subr.bf16.mxu1 %v1130_v24  ;;  %v38_v23 = vld [vmem:[%s1614_s0 + $0xb8] sm:$0xff]  ;;  %v1059_v24 = vcombine.low %v25_v12, %v29_v13  ;;  %v1068_v26 = vcombine.high %v33_v20, %v37_v21  ;;  %v89_v13 = vld [vmem:[%s1614_s0 + $0x250] sm:$0xff] }
  0x2c   :  { %v1070_v27 = vcombine.high %v34_v22, %v38_v23  ;;  %v1069_v33 = vcombine.low %v34_v22, %v38_v23  ;;  %v101_v22 = vld [vmem:[%s1614_s0 + $0x2b0] sm:$0xff]  ;;  %v98_v23 = vld [vmem:[%s1614_s0 + $0x298] sm:$0xff] }
  0x2e   :  { %821 = vmatpush1.bf16.msra.mxu0 %v1127_v29  ;;  %862 = vmatpush1.bf16.msra.mxu1 %v1129_v30  ;;  %v45_v29 = vld [vmem:[%s1614_s0 + $0xf0] sm:$0xff]  ;;  %v42_v30 = vld [vmem:[%s1614_s0 + $0xd8] sm:$0xff] }
  0x2f   :  { %822 = vmatprep.subr.bf16.mxu0 %v1136_v31  ;;  %863 = vmatprep.subr.bf16.mxu1 %v1138_v32  ;;  %v46_v31 = vld [vmem:[%s1614_s0 + $0xf8] sm:$0xff]  ;;  %v1067_v32 = vcombine.low %v33_v20, %v37_v21  ;;  %v1076_v34 = vcombine.high %v41_v28, %v45_v29  ;;  %v97_v21 = vld [vmem:[%s1614_s0 + $0x290] sm:$0xff] }
  0x30   :  { %v1078_v35 = vcombine.high %v42_v30, %v46_v31 }
  0x32   :  { %823 = vmatpush1.bf16.msra.mxu0 %v1135_v38  ;;  %864 = vmatpush1.bf16.msra.mxu1 %v1137_v39  ;;  %v54_v38 = vld [vmem:[%s1614_s0 + $0x138] sm:$0xff]  ;;  %v1075_v39 = vcombine.low %v41_v28, %v45_v29  ;;  %v105_v29 = vld [vmem:[%s1614_s0 + $0x2d0] sm:$0xff] }
  0x33   :  { %824 = vmatprep.subr.bf16.mxu0 %v1144_v40  ;;  %865 = vmatprep.subr.bf16.mxu1 %v1146_v41  ;;  %v1077_v40 = vcombine.low %v42_v30, %v46_v31  ;;  %v1084_v41 = vcombine.high %v49_v36, %v53_v37  ;;  %v109_v30 = vld [vmem:[%s1614_s0 + $0x2f0] sm:$0xff]  ;;  %v106_v31 = vld [vmem:[%s1614_s0 + $0x2d8] sm:$0xff] }
  0x36   :  { %825 = vmatpush1.bf16.msra.mxu0 %v1143_v46  ;;  %866 = vmatpush1.bf16.msra.mxu1 %v1145_v47  ;;  %v62_v46 = vld [vmem:[%s1614_s0 + $0x178] sm:$0xff]  ;;  %v1083_v47 = vcombine.low %v49_v36, %v53_v37  ;;  %v113_v37 = vld [vmem:[%s1614_s0 + $0x310] sm:$0xff] }
  0x37   :  { %826 = vmatprep.subr.bf16.mxu0 %v1152_v48  ;;  %867 = vmatprep.subr.bf16.mxu1 %v1154_v49  ;;  %v1092_v49 = vcombine.high %v57_v43, %v61_v44  ;;  %v1094_v50 = vcombine.high %v58_v45, %v62_v46 }
  0x3a   :  { %827 = vmatpush1.bf16.msra.mxu0 %v1151_v55  ;;  %868 = vmatpush1.bf16.msra.mxu1 %v1153_v56  ;;  %v70_v55 = vld [vmem:[%s1614_s0 + $0x1b8] sm:$0xff]  ;;  %v1091_v56 = vcombine.low %v57_v43, %v61_v44  ;;  %v121_v44 = vld [vmem:[%s1614_s0 + $0x350] sm:$0xff] }
  0x3b   :  { %828 = vmatprep.subr.bf16.mxu0 %v1160_v57  ;;  %869 = vmatprep.subr.bf16.mxu1 %v1162_v59  ;;  %v1093_v57 = vcombine.low %v58_v45, %v62_v46  ;;  %v1100_v59 = vcombine.high %v65_v51, %v69_v52  ;;  %v1102_v60 = vcombine.high %v66_v53, %v70_v55  ;;  %v125_v45 = vld [vmem:[%s1614_s0 + $0x370] sm:$0xff]  ;;  %v122_v46 = vld [vmem:[%s1614_s0 + $0x358] sm:$0xff] }
  0x3e   :  { %829 = vmatpush1.bf16.msra.mxu0 %v1159_v0  ;;  %870 = vmatpush1.bf16.msra.mxu1 %v1161_v1  ;;  %v78_v0 = vld [vmem:[%s1614_s0 + $0x1f8] sm:$0xff]  ;;  %v1099_v1 = vcombine.low %v65_v51, %v69_v52  ;;  %v129_v52 = vld [vmem:[%s1614_s0 + $0x390] sm:$0xff] }
  0x3f   :  { %830 = vmatprep.subr.bf16.mxu0 %v1168_v2  ;;  %871 = vmatprep.subr.bf16.mxu1 %v1170_v3  ;;  %v1101_v2 = vcombine.low %v66_v53, %v70_v55  ;;  %v1108_v3 = vcombine.high %v73_v61, %v77_v62  ;;  %v1110_v4 = vcombine.high %v74_v63, %v78_v0  ;;  %v133_v53 = vld [vmem:[%s1614_s0 + $0x3b0] sm:$0xff]  ;;  %v130_v55 = vld [vmem:[%s1614_s0 + $0x398] sm:$0xff] }
  0x42   :  { %831 = vmatpush1.bf16.msra.mxu0 %v1167_v8  ;;  %872 = vmatpush1.bf16.msra.mxu1 %v1169_v9  ;;  %v86_v8 = vld [vmem:[%s1614_s0 + $0x238] sm:$0xff]  ;;  %v1107_v9 = vcombine.low %v73_v61, %v77_v62  ;;  %v137_v62 = vld [vmem:[%s1614_s0 + $0x3d0] sm:$0xff] }
  0x43   :  { %882 = vmatprep.subr.bf16.mxu0 %v1052_v10  ;;  %923 = vmatprep.subr.bf16.mxu1 %v1054_v11  ;;  %v1109_v10 = vcombine.low %v74_v63, %v78_v0  ;;  %v1116_v11 = vcombine.high %v81_v5, %v85_v6  ;;  %v1118_v12 = vcombine.high %v82_v7, %v86_v8  ;;  %v141_v63 = vld [vmem:[%s1614_s0 + $0x3f0] sm:$0xff]  ;;  %v138_v0 = vld [vmem:[%s1614_s0 + $0x3d8] sm:$0xff] }
  0x45   :  { %833 = vmatmul.mubr.bf16.vlgmr.msra.gmra.mrb[0].mxu0 %v1291_v54  ;;  %874 = vmatmul.mubr.bf16.vlgmr.msra.gmra.mrb[0].mxu1 %v1291_v54 }
  0x46   :  { %883 = vmatpush1.bf16.msra.mxu0 %v1051_v16  ;;  %924 = vmatpush1.bf16.msra.mxu1 %v1053_v17  ;;  %v94_v16 = vld [vmem:[%s1614_s0 + $0x278] sm:$0xff]  ;;  %v1115_v17 = vcombine.low %v81_v5, %v85_v6  ;;  %v1171_v6 = vcombine.low %v137_v62, %v141_v63 }
  0x47   :  { %884 = vmatprep.subr.bf16.mxu0 %v1060_v18  ;;  %925 = vmatprep.subr.bf16.mxu1 %v1062_v19  ;;  %v1117_v18 = vcombine.low %v82_v7, %v86_v8  ;;  %v1124_v19 = vcombine.high %v89_v13, %v93_v14  ;;  %v1126_v20 = vcombine.high %v90_v15, %v94_v16  ;;  %v1183_v8 = vmov 1983009808  }
  0x48   :  { %914 = vmatprep.mubr.bf16.mxu0 %v1301_v58  ;;  %955 = vmatprep.mubr.bf16.mxu1 %v1301_v58  ;;  %v50_v58 = vld [vmem:[%s1614_s0 + $0x118] sm:$0xff] }
  0x49   :  { %v1086_v42 = vcombine.high %v50_v58, %v54_v38  ;;  %v1085_v48 = vcombine.low %v50_v58, %v54_v38  ;;  %v117_v58 = vld [vmem:[%s1614_s0 + $0x330] sm:$0xff]  ;;  %v114_v38 = vld [vmem:[%s1614_s0 + $0x318] sm:$0xff] }
  0x4a   :  { %885 = vmatpush1.bf16.msra.mxu0 %v1059_v24  ;;  %926 = vmatpush1.bf16.msra.mxu1 %v1061_v25  ;;  %v102_v24 = vld [vmem:[%s1614_s0 + $0x2b8] sm:$0xff]  ;;  %v1123_v25 = vcombine.low %v89_v13, %v93_v14 }
  0x4b   :  { %886 = vmatprep.subr.bf16.mxu0 %v1068_v26  ;;  %927 = vmatprep.subr.bf16.mxu1 %v1070_v27  ;;  %v1125_v26 = vcombine.low %v90_v15, %v94_v16  ;;  %v1132_v27 = vcombine.high %v97_v21, %v101_v22  ;;  %v1134_v28 = vcombine.high %v98_v23, %v102_v24 }
  0x4e   :  { %887 = vmatpush1.bf16.msra.mxu0 %v1067_v32  ;;  %928 = vmatpush1.bf16.msra.mxu1 %v1069_v33  ;;  %v110_v32 = vld [vmem:[%s1614_s0 + $0x2f8] sm:$0xff]  ;;  %v1131_v33 = vcombine.low %v97_v21, %v101_v22 }
  0x4f   :  { %888 = vmatprep.subr.bf16.mxu0 %v1076_v34  ;;  %929 = vmatprep.subr.bf16.mxu1 %v1078_v35  ;;  %v1133_v34 = vcombine.low %v98_v23, %v102_v24  ;;  %v1140_v35 = vcombine.high %v105_v29, %v109_v30  ;;  %v1142_v36 = vcombine.high %v106_v31, %v110_v32 }
  0x52   :  { %889 = vmatpush1.bf16.msra.mxu0 %v1075_v39  ;;  %930 = vmatpush1.bf16.msra.mxu1 %v1077_v40  ;;  %v118_v39 = vld [vmem:[%s1614_s0 + $0x338] sm:$0xff]  ;;  %v1139_v40 = vcombine.low %v105_v29, %v109_v30 }
  0x53   :  { %890 = vmatprep.subr.bf16.mxu0 %v1084_v41  ;;  %931 = vmatprep.subr.bf16.mxu1 %v1086_v42  ;;  %v1141_v41 = vcombine.low %v106_v31, %v110_v32  ;;  %v1148_v42 = vcombine.high %v113_v37, %v117_v58  ;;  %v1150_v43 = vcombine.high %v114_v38, %v118_v39 }
  0x56   :  { %891 = vmatpush1.bf16.msra.mxu0 %v1083_v47  ;;  %932 = vmatpush1.bf16.msra.mxu1 %v1085_v48  ;;  %v126_v47 = vld [vmem:[%s1614_s0 + $0x378] sm:$0xff]  ;;  %v1147_v48 = vcombine.low %v113_v37, %v117_v58 }
  0x57   :  { %892 = vmatprep.subr.bf16.mxu0 %v1092_v49  ;;  %933 = vmatprep.subr.bf16.mxu1 %v1094_v50  ;;  %v1149_v49 = vcombine.low %v114_v38, %v118_v39  ;;  %v1156_v50 = vcombine.high %v121_v44, %v125_v45  ;;  %v1158_v51 = vcombine.high %v122_v46, %v126_v47 }
  0x5a   :  { %893 = vmatpush1.bf16.msra.mxu0 %v1091_v56  ;;  %934 = vmatpush1.bf16.msra.mxu1 %v1093_v57  ;;  %v134_v56 = vld [vmem:[%s1614_s0 + $0x3b8] sm:$0xff]  ;;  %v1155_v57 = vcombine.low %v121_v44, %v125_v45 }
  0x5b   :  { %894 = vmatprep.subr.bf16.mxu0 %v1100_v59  ;;  %935 = vmatprep.subr.bf16.mxu1 %v1102_v60  ;;  %v1157_v59 = vcombine.low %v122_v46, %v126_v47  ;;  %v1164_v60 = vcombine.high %v129_v52, %v133_v53  ;;  %v1166_v61 = vcombine.high %v130_v55, %v134_v56 }
  0x5e   :  { %895 = vmatpush1.bf16.msra.mxu0 %v1099_v1  ;;  %936 = vmatpush1.bf16.msra.mxu1 %v1101_v2  ;;  %v142_v1 = vld [vmem:[%s1614_s0 + $0x3f8] sm:$0xff]  ;;  %v1163_v2 = vcombine.low %v129_v52, %v133_v53 }
  0x5f   :  { %896 = vmatprep.subr.bf16.mxu0 %v1108_v3  ;;  %937 = vmatprep.subr.bf16.mxu1 %v1110_v4  ;;  %v1165_v3 = vcombine.low %v130_v55, %v134_v56  ;;  %v1172_v4 = vcombine.high %v137_v62, %v141_v63  ;;  %v1174_v5 = vcombine.high %v138_v0, %v142_v1 }
  0x60   :  { %v1173_v7 = vcombine.low %v138_v0, %v142_v1 }
  0x62   :  { %897 = vmatpush1.bf16.msra.mxu0 %v1107_v9  ;;  %938 = vmatpush1.bf16.msra.mxu1 %v1109_v10  ;;  %v1007_v9 = vunpack.c.l.s4 %v1183_v8  ;;  %v1009_v10 = vlaneseq }
  0x63   :  { %898 = vmatprep.subr.bf16.mxu0 %v1116_v11  ;;  %939 = vmatprep.subr.bf16.mxu1 %v1118_v12 }
  0x64   :  { %v1008_v16 = vunpack.c.0.s8 %v1007_v9 }
  0x66   :  { %899 = vmatpush1.bf16.msra.mxu0 %v1115_v17  ;;  %940 = vmatpush1.bf16.msra.mxu1 %v1117_v18  ;;  %v1010_v17 = vshrl.u32 %v1009_v10, 7 }
  0x67   :  { %900 = vmatprep.subr.bf16.mxu0 %v1124_v19  ;;  %941 = vmatprep.subr.bf16.mxu1 %v1126_v20 }
  0x6a   :  { %901 = vmatpush1.bf16.msra.mxu0 %v1123_v25  ;;  %942 = vmatpush1.bf16.msra.mxu1 %v1125_v26 }
  0x6b   :  { %902 = vmatprep.subr.bf16.mxu0 %v1132_v27  ;;  %943 = vmatprep.subr.bf16.mxu1 %v1134_v28  ;;  %v1011_v28 = vsub.s32 %v1008_v16, %v1010_v17 }
  0x6e   :  { %903 = vmatpush1.bf16.msra.mxu0 %v1131_v33  ;;  %944 = vmatpush1.bf16.msra.mxu1 %v1133_v34 }
  0x6f   :  { %904 = vmatprep.subr.bf16.mxu0 %v1140_v35  ;;  %945 = vmatprep.subr.bf16.mxu1 %v1142_v36 }
  0x72   :  { %905 = vmatpush1.bf16.msra.mxu0 %v1139_v40  ;;  %946 = vmatpush1.bf16.msra.mxu1 %v1141_v41 }
  0x73   :  { %906 = vmatprep.subr.bf16.mxu0 %v1148_v42  ;;  %947 = vmatprep.subr.bf16.mxu1 %v1150_v43 }
  0x76   :  { %907 = vmatpush1.bf16.msra.mxu0 %v1147_v48  ;;  %948 = vmatpush1.bf16.msra.mxu1 %v1149_v49 }
  0x77   :  { %908 = vmatprep.subr.bf16.mxu0 %v1156_v50  ;;  %949 = vmatprep.subr.bf16.mxu1 %v1158_v51 }
  0x7a   :  { %909 = vmatpush1.bf16.msra.mxu0 %v1155_v57  ;;  %950 = vmatpush1.bf16.msra.mxu1 %v1157_v59 }
  0x7b   :  { %910 = vmatprep.subr.bf16.mxu0 %v1164_v60  ;;  %951 = vmatprep.subr.bf16.mxu1 %v1166_v61 }
  0x7e   :  { %911 = vmatpush1.bf16.msra.mxu0 %v1163_v2  ;;  %952 = vmatpush1.bf16.msra.mxu1 %v1165_v3 }
  0x7f   :  { %912 = vmatprep.subr.bf16.mxu0 %v1172_v4  ;;  %953 = vmatprep.subr.bf16.mxu1 %v1174_v5 }
  0x82   :  { %913 = vmatpush1.bf16.msra.mxu0 %v1171_v6  ;;  %954 = vmatpush1.bf16.msra.mxu1 %v1173_v7 }
  0x85   :  { %915 = vmatmul.mubr.bf16.vlgmr.msra.gmra.mrb[4].mxu0 %v1291_v54  ;;  %956 = vmatmul.mubr.bf16.vlgmr.msra.gmra.mrb[4].mxu1 %v1291_v54 }
  0x9c   :  { %v147_v11 = vpop.permute.xlu0 %146 }
 0x118   :  { %v834_v12 = vpop.f32.mrb[0].mxu0  ;;  %v875_v14 = vpop.f32.mrb[0].mxu1 }
 0x119   :  { %v835_v13 = vadd.f32 %v834_v12, %v147_v11  ;;  %v836_v15 = vpop.f32.mrb[1].mxu0  ;;  %v876_v18 = vadd.f32 %v875_v14, %v147_v11  ;;  %v877_v20 = vpop.f32.mrb[1].mxu1 }
 0x11a   :  { %v837_v19 = vadd.f32 %v836_v15, %v147_v11  ;;  %v838_v21 = vpop.f32.mrb[2].mxu0  ;;  %v878_v23 = vadd.f32 %v877_v20, %v147_v11  ;;  %v879_v24 = vpop.f32.mrb[2].mxu1 }
 0x11b   :  { %vm964_vm0 = vcmp.ge.f32.partialorder %v835_v13, 0.0  ;;  %v972_v22 = vmul.f32 0.2, %v835_v13  ;;  %v839_v25 = vpop.f32.mrb[3].mxu0  ;;  %vm966_vm1 = vcmp.ge.f32.partialorder %v876_v18, 0.0  ;;  %v880_v30 = vpop.f32.mrb[3].mxu1 }
 0x11c   :  { %v974_v54 = vmul.f32 0.2, %v876_v18  ;;  %vm965_vm2 = vcmp.ge.f32.partialorder %v837_v19, 0.0  ;;  %v973_v26 = vmul.f32 0.2, %v837_v19  ;;  %vm967_vm3 = vcmp.ge.f32.partialorder %v878_v23, 0.0 }
 0x11d   :  { %v980_v27 = vsel %vm964_vm0, %v835_v13, %v972_v22  ;;  %v975_v29 = vmul.f32 0.2, %v878_v23 }
 0x11e   :  { %v982_v31 = vsel %vm966_vm1, %v876_v18, %v974_v54  ;;  %v981_v32 = vsel %vm965_vm2, %v837_v19, %v973_v26 }
 0x11f   :  { %v1175_v33 = vpack.c.bf16 %v981_v32, %v980_v27  ;;  %v983_v34 = vsel %vm967_vm3, %v878_v23, %v975_v29 }
 0x120   :  { %v1176_v35 = vpack.c.bf16 %v983_v34, %v982_v31 }
 0x121   :  { %v1012_v36 = vrot.slane %v1175_v33, %v1011_v28 }
 0x122   :  { %v1019_v37 = vrot.slane %v1176_v35, %v1011_v28 }
 0x124   :  { %v1020_v58 = vcombine.low %v1012_v36, %v1019_v37 }
 0x126   :  { %1040 = vst [vmem:[%s1617_s3] sm:$0xff] %v1020_v58 }
 0x158   :  { %v916_v38 = vpop.f32.mrb[4].mxu0  ;;  %v957_v40 = vpop.f32.mrb[4].mxu1 }
 0x159   :  { %v917_v39 = vadd.f32 %v916_v38, %v147_v11  ;;  %v918_v41 = vpop.f32.mrb[5].mxu0  ;;  %v958_v42 = vadd.f32 %v957_v40, %v147_v11  ;;  %v959_v44 = vpop.f32.mrb[5].mxu1 }
 0x15a   :  { %v919_v43 = vadd.f32 %v918_v41, %v147_v11  ;;  %v920_v45 = vpop.f32.mrb[6].mxu0  ;;  %v960_v47 = vadd.f32 %v959_v44, %v147_v11  ;;  %v961_v48 = vpop.f32.mrb[6].mxu1 }
 0x15b   :  { %vm968_vm4 = vcmp.ge.f32.partialorder %v917_v39, 0.0  ;;  %v976_v46 = vmul.f32 0.2, %v917_v39  ;;  %v921_v49 = vpop.f32.mrb[7].mxu0  ;;  %vm970_vm5 = vcmp.ge.f32.partialorder %v958_v42, 0.0  ;;  %v962_v55 = vpop.f32.mrb[7].mxu1 }
 0x15c   :  { %v978_v50 = vmul.f32 0.2, %v958_v42  ;;  %vm969_vm6 = vcmp.ge.f32.partialorder %v919_v43, 0.0  ;;  %v977_v51 = vmul.f32 0.2, %v919_v43  ;;  %vm971_vm7 = vcmp.ge.f32.partialorder %v960_v47, 0.0 }
 0x15d   :  { %v984_v52 = vsel %vm968_vm4, %v917_v39, %v976_v46  ;;  %v979_v53 = vmul.f32 0.2, %v960_v47 }
 0x15e   :  { %v986_v56 = vsel %vm970_vm5, %v958_v42, %v978_v50  ;;  %v985_v57 = vsel %vm969_vm6, %v919_v43, %v977_v51 }
 0x15f   :  { %v1177_v59 = vpack.c.bf16 %v985_v57, %v984_v52  ;;  %v987_v60 = vsel %vm971_vm7, %v960_v47, %v979_v53 }
 0x160   :  { %v1178_v61 = vpack.c.bf16 %v987_v60, %v986_v56 }
 0x161   :  { %v1029_v62 = vrot.slane %v1177_v59, %v1011_v28 }
 0x162   :  { %v1036_v63 = vrot.slane %v1178_v61, %v1011_v28 }
 0x164   :  { %v1037_v0 = vcombine.low %v1029_v62, %v1036_v63 }
 0x166   :  { %1041 = vst [vmem:[%s1617_s3 + $0x8] sm:$0xff] %v1037_v0 }

// kernel: patchgan_forward.4
= control target key start
LH: loop header
LB: loop body
LE: loop exit
PB: predicated region body
PF: predicated region fallthrough
CT: control target
= control target key end

     0   :  { %v305_v1 = vmov 0   ;;  %s399_s0 = inlined_call_operand.vmem [shape: bf16[256,128], index: 0, kind: input, shape index: {}]   ;;  %s400_s1 = inlined_call_operand.vmem [shape: bf16[8,256], index: 1, kind: input, shape index: {}]   ;;  %s401_s2 = inlined_call_operand.vmem [shape: f32[8,1], index: 2, kind: input, shape index: {}]   ;;  %s402_s3 = inlined_call_operand.vmem [shape: f32[8,1], index: 3, kind: input, shape index: {}]   ;;  %s403_s4 = inlined_call_operand.vmem [shape: f32[8,1], index: 4, kind: input, shape index: {}]   ;;  %s404_s5 = inlined_call_operand.vmem [shape: bf16[8,128], index: 5, kind: output, shape index: {}]  }
   0x1   :  { %v285_v0 = vld [vmem:[%s399_s0 + $0x40] sm:$0xff]   ;;  %283 = vset.pattern.permute.xlu0 %v305_v1  ;;  %284 = vset.pattern.permute.xlu1 %v305_v1  ;;  %v287_v3 = vld [vmem:[%s399_s0 + $0x48] sm:$0xff]   ;;  %v289_v5 = vld [vmem:[%s399_s0 + $0x50] sm:$0xff]  }
   0x2   :  { %v286_v2 = vld [vmem:[%s399_s0] sm:$0xff]   ;;  %260 = vmatprep.subr.bf16.mxu0 %v285_v0  ;;  %v288_v4 = vld [vmem:[%s399_s0 + $0x8] sm:$0xff]   ;;  %v290_v6 = vld [vmem:[%s399_s0 + $0x10] sm:$0xff]  }
   0x3   :  { %261 = vmatpush3.bf16.msra.mxu0 %v286_v2  ;;  %v291_v7 = vld [vmem:[%s399_s0 + $0x58] sm:$0xff]   ;;  %v293_v9 = vld [vmem:[%s399_s0 + $0x60] sm:$0xff]   ;;  %v295_v11 = vld [vmem:[%s399_s0 + $0x68] sm:$0xff]  }
   0x4   :  { %262 = vmatprep.subr.bf16.mxu0 %v287_v3  ;;  %v292_v8 = vld [vmem:[%s399_s0 + $0x18] sm:$0xff]   ;;  %v294_v10 = vld [vmem:[%s399_s0 + $0x20] sm:$0xff]   ;;  %v296_v15 = vld [vmem:[%s399_s0 + $0x28] sm:$0xff]  }
   0x5   :  { %v21_v12 = vld [vmem:[%s400_s1] sm:$0xff]  ;;  %v297_v16 = vld [vmem:[%s399_s0 + $0x70] sm:$0xff]   ;;  %v299_v18 = vld [vmem:[%s399_s0 + $0x78] sm:$0xff]  }
   0x6   :  { %v54_v13 = vld [vmem:[%s401_s2] sm:$0xff]  ;;  %v243_v14 = vcombine.high %v21_v12, %v21_v12  ;;  %v298_v17 = vld [vmem:[%s399_s0 + $0x30] sm:$0xff]   ;;  %v300_v19 = vld [vmem:[%s399_s0 + $0x38] sm:$0xff]   ;;  %v242_v20 = vcombine.low %v21_v12, %v21_v12 }
   0x7   :  { %263 = vmatpush3.bf16.msra.mxu0 %v288_v4  ;;  %57 = vperm.xlu0 %283, %v54_v13   ;;  %v214_v37 = vld [vmem:[%s402_s3] sm:$0xff] }
   0x8   :  { %264 = vmatprep.subr.bf16.mxu0 %v289_v5  ;;  %195 = vmatprep.mubr.bf16.mxu0 %v243_v14  ;;  %v218_v40 = vld [vmem:[%s403_s4] sm:$0xff] }
   0xb   :  { %265 = vmatpush3.bf16.msra.mxu0 %v290_v6 }
   0xc   :  { %266 = vmatprep.subr.bf16.mxu0 %v291_v7 }
   0xf   :  { %267 = vmatpush3.bf16.msra.mxu0 %v292_v8 }
  0x10   :  { %268 = vmatprep.subr.bf16.mxu0 %v293_v9 }
  0x13   :  { %269 = vmatpush3.bf16.msra.mxu0 %v294_v10 }
  0x14   :  { %270 = vmatprep.subr.bf16.mxu0 %v295_v11 }
  0x17   :  { %271 = vmatpush3.bf16.msra.mxu0 %v296_v15 }
  0x18   :  { %272 = vmatprep.subr.bf16.mxu0 %v297_v16 }
  0x1b   :  { %273 = vmatpush3.bf16.msra.mxu0 %v298_v17 }
  0x1c   :  { %274 = vmatprep.subr.bf16.mxu0 %v299_v18 }
  0x1f   :  { %275 = vmatpush3.bf16.msra.mxu0 %v300_v19 }
  0x22   :  { %196 = vmatmul.mubr.bf16.vlgmr.msra.gmra.mrb[0].mxu0 %v242_v20 }
  0x86   :  { %v58_v23 = vpop.permute.xlu0 %57 }
  0xf5   :  { %v276_v21 = vpop.f32.mrb[0].mxu0 }
  0xf6   :  { %v277_v22 = vpop.f32.mrb[1].mxu0 }
  0xf7   :  { %v278_v24 = vadd.f32 %v277_v22, %v276_v21  ;;  %v279_v25 = vpop.f32.mrb[2].mxu0 }
  0xf8   :  { %v280_v26 = vpop.f32.mrb[3].mxu0 }
  0xf9   :  { %v198_v27 = vadd.f32 %v278_v24, %v58_v23 }
  0xfb   :  { %203 = vadd.xlane.f32.xlu0 %v198_v27  ;;  %v207_v28 = vmul.f32 %v198_v27, %v198_v27 }
  0xfd   :  { %208 = vadd.xlane.f32.xlu1 %v207_v28 }
 0x188   :  { %v204_v29 = vpop.xlane.xlu0 %203 }
 0x189   :  { %v206_v30 = vmul.f32 0.0078125, %v204_v29 }
 0x18a   :  { %v209_v31 = vpop.xlane.xlu1 %208 }
 0x18b   :  { %v211_v32 = vmul.f32 %v206_v30, %v206_v30  ;;  %v210_v33 = vmul.f32 0.0078125, %v209_v31 }
 0x18d   :  { %v212_v34 = vsub.f32 %v210_v33, %v211_v32 }
 0x18f   :  { %v213_v35 = vmax.f32 %v212_v34, 0.0 }
 0x191   :  { %v215_v36 = vadd.f32 1e-05, %v213_v35 }
 0x193   :  { %303 = vrsqrt.f32 %v215_v36 }
 0x19d   :  { %v304_v38 = vpop.eup %303 }
 0x19e   :  { %v217_v39 = vmul.f32 %v304_v38, %v214_v37 }
 0x1a0   :  { %223 = vperm.xlu1 %284, %v217_v39   ;;  %v219_v41 = vmul.f32 %v217_v39, %v206_v30 }
 0x1a2   :  { %v220_v42 = vsub.f32 %v218_v40, %v219_v41 }
 0x1a4   :  { %229 = vperm.xlu1 %284, %v220_v42  }
 0x21f   :  { %v224_v43 = vpop.permute.xlu1 %223 }
 0x220   :  { %v226_v44 = vmul.f32 %v224_v43, %v198_v27 }
 0x223   :  { %v230_v45 = vpop.permute.xlu1 %229 }
 0x224   :  { %v232_v46 = vadd.f32 %v230_v45, %v226_v44 }
 0x226   :  { %vm233_vm0 = vcmp.ge.f32.partialorder %v232_v46, 0.0  ;;  %v234_v47 = vmul.f32 0.2, %v232_v46 }
 0x228   :  { %v235_v48 = vsel %vm233_vm0, %v232_v46, %v234_v47 }
 0x229   :  { %v236_v49 = vpack.c.bf16 %v235_v48, %v235_v48 }
 0x22b   :  { %237 = vst [vmem:[%s404_s5] sm:$0xf] %v236_v49 }

// kernel: patchgan_forward.5
= control target key start
LH: loop header
LB: loop body
LE: loop exit
PB: predicated region body
PF: predicated region fallthrough
CT: control target
= control target key end

     0   :  { %v871_v1 = vmov 0   ;;  %vm455_vm0 = vcmask 130048   ;;  %vm873_vm1 = vmmov 0   ;;  %vm604_vm6 = vcmask 261120   ;;  %s1112_s0 = inlined_call_operand.vmem [shape: bf16[512,16], index: 0, kind: input, shape index: {}]   ;;  %s1113_s1 = inlined_call_operand.vmem [shape: bf16[32,512], index: 1, kind: input, shape index: {}]   ;;  %s1114_s2 = inlined_call_operand.vmem [shape: f32[32,1], index: 2, kind: input, shape index: {}]   ;;  %s1115_s6 = inlined_call_operand.<no memory space> [shape: f32[1,1], index: 6, kind: input, shape index: {}]   ;;  %s1116_s3 = inlined_call_operand.vmem [shape: f32[32,1], index: 3, kind: input, shape index: {}]   ;;  %s1117_s4 = inlined_call_operand.vmem [shape: f32[32,1], index: 4, kind: input, shape index: {}]   ;;  %s1118_s5 = inlined_call_operand.vmem [shape: f32[1,32], index: 5, kind: input, shape index: {}]   ;;  %s1119_s7 = inlined_call_operand.vmem [shape: f32[1,16], index: 7, kind: output, shape index: {}]  }
   0x1   :  { %v815_v0 = vld [vmem:[%s1112_s0 + $0x40] sm:$0xff]   ;;  %813 = vset.pattern.permute.xlu0 %v871_v1  ;;  %814 = vset.pattern.permute.xlu1 %v871_v1  ;;  %v819_v5 = vld [vmem:[%s1112_s0 + $0x48] sm:$0xff]   ;;  %v823_v9 = vld [vmem:[%s1112_s0 + $0x50] sm:$0xff]   ;;  %vm684_vm7 = vcmask 122880  }
   0x2   :  { %v816_v2 = vld [vmem:[%s1112_s0 + $0xc0] sm:$0xff]   ;;  %731 = vmatprep.subr.bf16.mxu0 %v815_v0  ;;  %v820_v6 = vld [vmem:[%s1112_s0 + $0xc8] sm:$0xff]   ;;  %v824_v10 = vld [vmem:[%s1112_s0 + $0xd0] sm:$0xff]  }
   0x3   :  { %v817_v3 = vld [vmem:[%s1112_s0] sm:$0xff]   ;;  %759 = vmatprep.subr.bf16.mxu1 %v816_v2  ;;  %v821_v7 = vld [vmem:[%s1112_s0 + $0x8] sm:$0xff]   ;;  %v825_v11 = vld [vmem:[%s1112_s0 + $0x10] sm:$0xff]  }
   0x4   :  { %v818_v4 = vld [vmem:[%s1112_s0 + $0x80] sm:$0xff]   ;;  %732 = vmatpush3.bf16.msra.mxu0 %v817_v3  ;;  %v822_v8 = vld [vmem:[%s1112_s0 + $0x88] sm:$0xff]   ;;  %v826_v12 = vld [vmem:[%s1112_s0 + $0x90] sm:$0xff]  }
   0x5   :  { %760 = vmatpush3.bf16.msra.mxu1 %v818_v4  ;;  %733 = vmatprep.subr.bf16.mxu0 %v819_v5  ;;  %v827_v13 = vld [vmem:[%s1112_s0 + $0x58] sm:$0xff]   ;;  %v831_v17 = vld [vmem:[%s1112_s0 + $0x60] sm:$0xff]   ;;  %v835_v21 = vld [vmem:[%s1112_s0 + $0x68] sm:$0xff]  }
   0x6   :  { %761 = vmatprep.subr.bf16.mxu1 %v820_v6  ;;  %v828_v14 = vld [vmem:[%s1112_s0 + $0xd8] sm:$0xff]   ;;  %v832_v18 = vld [vmem:[%s1112_s0 + $0xe0] sm:$0xff]   ;;  %v836_v22 = vld [vmem:[%s1112_s0 + $0xe8] sm:$0xff]  }
   0x7   :  { %v829_v15 = vld [vmem:[%s1112_s0 + $0x18] sm:$0xff]   ;;  %v833_v19 = vld [vmem:[%s1112_s0 + $0x20] sm:$0xff]   ;;  %v837_v23 = vld [vmem:[%s1112_s0 + $0x28] sm:$0xff]  }
   0x8   :  { %734 = vmatpush3.bf16.msra.mxu0 %v821_v7  ;;  %v830_v16 = vld [vmem:[%s1112_s0 + $0x98] sm:$0xff]   ;;  %v834_v20 = vld [vmem:[%s1112_s0 + $0xa0] sm:$0xff]   ;;  %v838_v24 = vld [vmem:[%s1112_s0 + $0xa8] sm:$0xff]  }
   0x9   :  { %762 = vmatpush3.bf16.msra.mxu1 %v822_v8  ;;  %735 = vmatprep.subr.bf16.mxu0 %v823_v9  ;;  %v839_v25 = vld [vmem:[%s1112_s0 + $0x70] sm:$0xff]   ;;  %v843_v29 = vld [vmem:[%s1112_s0 + $0x78] sm:$0xff]   ;;  %v101_v39 = vld [vmem:[%s1114_s2] sm:$0xff] }
   0xa   :  { %763 = vmatprep.subr.bf16.mxu1 %v824_v10  ;;  %v840_v26 = vld [vmem:[%s1112_s0 + $0xf0] sm:$0xff]   ;;  %v844_v30 = vld [vmem:[%s1112_s0 + $0xf8] sm:$0xff]   ;;  %107 = vperm.xlu0 %813, %v101_v39   ;;  %v102_v41 = vld [vmem:[%s1114_s2 + $0x8] sm:$0xff] }
   0xb   :  { %v841_v27 = vld [vmem:[%s1112_s0 + $0x30] sm:$0xff]   ;;  %v845_v31 = vld [vmem:[%s1112_s0 + $0x38] sm:$0xff]  }
   0xc   :  { %736 = vmatpush3.bf16.msra.mxu0 %v825_v11  ;;  %v842_v28 = vld [vmem:[%s1112_s0 + $0xb0] sm:$0xff]   ;;  %v846_v32 = vld [vmem:[%s1112_s0 + $0xb8] sm:$0xff]  }
   0xd   :  { %764 = vmatpush3.bf16.msra.mxu1 %v826_v12  ;;  %737 = vmatprep.subr.bf16.mxu0 %v827_v13  ;;  %v847_v33 = vld [vmem:[%s1113_s1] ss:$16 sps:$4 sm:$0xff]   ;;  %v849_v34 = vld [vmem:[%s1113_s1 + $0x4] ss:$16 sps:$4 sm:$0xff]   ;;  %v850_v35 = vld [vmem:[%s1113_s1 + $0x8] ss:$16 sps:$4 sm:$0xff]  }
   0xe   :  { %765 = vmatprep.subr.bf16.mxu1 %v828_v14  ;;  %v852_v36 = vld [vmem:[%s1113_s1 + $0xc] ss:$16 sps:$4 sm:$0xff]   ;;  %389 = vmatprep.mubr.bf16.mxu0 %v849_v34  ;;  %v853_v37 = vld [vmem:[%s1113_s1 + $0x24] ss:$16 sps:$4 sm:$0xff]   ;;  %v855_v42 = vld [vmem:[%s1113_s1 + $0x20] ss:$16 sps:$4 sm:$0xff]  }
   0xf   :  { %438 = vmatprep.mubr.bf16.mxu1 %v852_v36  ;;  %v856_v38 = vld [vmem:[%s1113_s1 + $0x2c] ss:$16 sps:$4 sm:$0xff]   ;;  %v103_v40 = vld [vmem:[%s1114_s2 + $0x10] sm:$0xff]  ;;  %v858_v44 = vld [vmem:[%s1113_s1 + $0x28] ss:$16 sps:$4 sm:$0xff]   ;;  %112 = vperm.xlu0 %813, %v102_v41  }
  0x10   :  { %738 = vmatpush3.bf16.msra.mxu0 %v829_v15  ;;  %117 = vperm.xlu1 %814, %v103_v40   ;;  %v104_v43 = vld [vmem:[%s1114_s2 + $0x18] sm:$0xff] }
  0x11   :  { %766 = vmatpush3.bf16.msra.mxu1 %v830_v16  ;;  %739 = vmatprep.subr.bf16.mxu0 %v831_v17 }
  0x12   :  { %767 = vmatprep.subr.bf16.mxu1 %v832_v18 }
  0x14   :  { %740 = vmatpush3.bf16.msra.mxu0 %v833_v19  ;;  %122 = vperm.xlu1 %814, %v104_v43  }
  0x15   :  { %768 = vmatpush3.bf16.msra.mxu1 %v834_v20  ;;  %741 = vmatprep.subr.bf16.mxu0 %v835_v21 }
  0x16   :  { %769 = vmatprep.subr.bf16.mxu1 %v836_v22 }
  0x18   :  { %742 = vmatpush3.bf16.msra.mxu0 %v837_v23 }
  0x19   :  { %770 = vmatpush3.bf16.msra.mxu1 %v838_v24  ;;  %743 = vmatprep.subr.bf16.mxu0 %v839_v25 }
  0x1a   :  { %771 = vmatprep.subr.bf16.mxu1 %v840_v26 }
  0x1c   :  { %744 = vmatpush3.bf16.msra.mxu0 %v841_v27 }
  0x1d   :  { %772 = vmatpush3.bf16.msra.mxu1 %v842_v28  ;;  %745 = vmatprep.subr.bf16.mxu0 %v843_v29  ;;  %v12_v29 = vstv %s1115_s6 }
  0x1e   :  { %773 = vmatprep.subr.bf16.mxu1 %v844_v30  ;;  %13 = vst [vmem:[#allocation2] sm:$0x1] %v12_v29 }
  0x20   :  { %746 = vmatpush3.bf16.msra.mxu0 %v845_v31 }
  0x21   :  { %774 = vmatpush3.bf16.msra.mxu1 %v846_v32 }
  0x23   :  { %390 = vmatmul.mubr.bf16.vlgmr.msra.gmra.mrb[0].mxu0 %v847_v33 }
  0x24   :  { %439 = vmatmul.mubr.bf16.vlgmr.msra.gmra.mrb[0].mxu1 %v850_v35  ;;  %397 = vmatprep.mubr.bf16.mxu0 %v853_v37 }
  0x25   :  { %446 = vmatprep.mubr.bf16.mxu1 %v856_v38 }
  0x2b   :  { %398 = vmatmul.mubr.bf16.gmra.mrb[4].mxu0 %v855_v42 }
  0x2c   :  { %447 = vmatmul.mubr.bf16.gmra.mrb[4].mxu1 %v858_v44 }
  0x89   :  { %v108_v45 = vpop.permute.xlu0 %107 }
  0x8e   :  { %v113_v58 = vpop.permute.xlu0 %112 }
  0x8f   :  { %v118_v62 = vpop.permute.xlu1 %117 }
  0x93   :  { %v123_v17 = vpop.permute.xlu1 %122 }
  0xf6   :  { %v747_v46 = vpop.f32.mrb[0].mxu0 }
  0xf7   :  { %v775_v47 = vpop.f32.mrb[0].mxu1  ;;  %v748_v48 = vpop.f32.mrb[1].mxu0 }
  0xf8   :  { %v749_v49 = vadd.f32 %v748_v48, %v747_v46  ;;  %v776_v50 = vpop.f32.mrb[1].mxu1  ;;  %v750_v51 = vpop.f32.mrb[2].mxu0 }
  0xf9   :  { %v777_v52 = vadd.f32 %v776_v50, %v775_v47  ;;  %v778_v53 = vpop.f32.mrb[2].mxu1  ;;  %v751_v54 = vpop.f32.mrb[3].mxu0 }
  0xfa   :  { %v392_v55 = vadd.f32 %v749_v49, %v108_v45  ;;  %v752_v56 = vadd.f32 %v751_v54, %v750_v51  ;;  %v779_v57 = vpop.f32.mrb[3].mxu1 }
  0xfb   :  { %v780_v59 = vadd.f32 %v779_v57, %v778_v53 }
  0xfc   :  { %v1047_v60 = vadd.f32 %v777_v52, %v392_v55  ;;  %v395_v61 = vadd.f32 %v752_v56, %v113_v58 }
  0xfe   :  { %v1049_v63 = vadd.f32 %v780_v59, %v395_v61  ;;  %v753_v0 = vpop.f32.mrb[4].mxu0  ;;  %v456_v1 = vsel %vm455_vm0, %v1047_v60, 0.0  ;;  %v473_v2 = vmul.f32 %v1047_v60, %v1047_v60 }
  0xff   :  { %v754_v3 = vpop.f32.mrb[5].mxu0  ;;  %v781_v4 = vpop.f32.mrb[4].mxu1  ;;  %457 = vadd.xlane.f32.xlu0 %v456_v1 }
 0x100   :  { %v755_v5 = vadd.f32 %v754_v3, %v753_v0  ;;  %v756_v6 = vpop.f32.mrb[6].mxu0  ;;  %v782_v7 = vpop.f32.mrb[5].mxu1  ;;  %v459_v8 = vsel %vm455_vm0, %v1049_v63, 0.0  ;;  %v477_v15 = vsel %vm455_vm0, %v473_v2, 0.0  ;;  %v474_v16 = vmul.f32 %v1049_v63, %v1049_v63  ;;  %v521_v3 = vld [vmem:[%s1117_s4] sm:$0xff] }
 0x101   :  { %v783_v9 = vadd.f32 %v782_v7, %v781_v4  ;;  %v757_v10 = vpop.f32.mrb[7].mxu0  ;;  %v784_v11 = vpop.f32.mrb[6].mxu1  ;;  %460 = vadd.xlane.f32.xlu1 %v459_v8  ;;  %v506_v4 = vld [vmem:[%s1116_s3 + $0x8] sm:$0xff] }
 0x102   :  { %v400_v12 = vadd.f32 %v755_v5, %v118_v62  ;;  %v758_v13 = vadd.f32 %v757_v10, %v756_v6  ;;  %v785_v14 = vpop.f32.mrb[7].mxu1  ;;  %v480_v23 = vsel %vm455_vm0, %v474_v16, 0.0  ;;  %v505_v62 = vld [vmem:[%s1116_s3] sm:$0xff]  ;;  %v522_v10 = vld [vmem:[%s1117_s4 + $0x8] sm:$0xff]  ;;  %v508_v16 = vld [vmem:[%s1116_s3 + $0x18] sm:$0xff] }
 0x103   :  { %v786_v18 = vadd.f32 %v785_v14, %v784_v11  ;;  %478 = vadd.xlane.f32.xlu0 %v477_v15  ;;  %v523_v15 = vld [vmem:[%s1117_s4 + $0x10] sm:$0xff] }
 0x104   :  { %v1060_v19 = vadd.f32 %v783_v9, %v400_v12  ;;  %v403_v20 = vadd.f32 %v758_v13, %v123_v17  ;;  %v507_v9 = vld [vmem:[%s1116_s3 + $0x10] sm:$0xff] }
 0x106   :  { %v1062_v21 = vadd.f32 %v786_v18, %v403_v20  ;;  %v462_v22 = vsel %vm455_vm0, %v1060_v19, 0.0  ;;  %v475_v24 = vmul.f32 %v1060_v19, %v1060_v19 }
 0x107   :  { %463 = vadd.xlane.f32.xlu1 %v462_v22  ;;  %481 = vadd.xlane.f32.xlu0 %v480_v23  ;;  %v524_v23 = vld [vmem:[%s1117_s4 + $0x18] sm:$0xff] }
 0x108   :  { %v483_v25 = vsel %vm455_vm0, %v475_v24, 0.0  ;;  %v465_v26 = vsel %vm455_vm0, %v1062_v21, 0.0  ;;  %v476_v27 = vmul.f32 %v1062_v21, %v1062_v21 }
 0x10a   :  { %v486_v28 = vsel %vm455_vm0, %v476_v27, 0.0  ;;  %v872_v27 = vmov 0.0|0.0  }
 0x10b   :  { %484 = vadd.xlane.f32.xlu1 %v483_v25  ;;  %466 = vadd.xlane.f32.xlu0 %v465_v26  ;;  %v594_v25 = vld [vmem:[#allocation2] sm:$0x1] }
 0x10c   :  { %803 = vmatprep.subr.bf16.mxu0 %v872_v27 }
 0x10f   :  { %487 = vadd.xlane.f32.xlu0 %v486_v28  ;;  %v874_v28 = vmov 0.0  }
 0x110   :  { %800 = vmatprep.mubr.msk.f32.mxu0 %vm873_vm1, %v874_v28 }
 0x18c   :  { %v458_v30 = vpop.xlane.xlu0 %457 }
 0x18d   :  { %v469_v31 = vmul.f32 0.0625, %v458_v30 }
 0x18e   :  { %v461_v32 = vpop.xlane.xlu1 %460 }
 0x18f   :  { %v493_v34 = vmul.f32 %v469_v31, %v469_v31  ;;  %v470_v35 = vmul.f32 0.0625, %v461_v32 }
 0x190   :  { %v479_v33 = vpop.xlane.xlu0 %478 }
 0x191   :  { %v489_v36 = vmul.f32 0.0625, %v479_v33  ;;  %v494_v40 = vmul.f32 %v470_v35, %v470_v35 }
 0x193   :  { %v497_v37 = vsub.f32 %v489_v36, %v493_v34 }
 0x194   :  { %v464_v38 = vpop.xlane.xlu1 %463  ;;  %v482_v39 = vpop.xlane.xlu0 %481 }
 0x195   :  { %v501_v41 = vmax.f32 %v497_v37, 0.0  ;;  %v471_v42 = vmul.f32 0.0625, %v464_v38  ;;  %v490_v43 = vmul.f32 0.0625, %v482_v39 }
 0x197   :  { %v509_v44 = vadd.f32 1e-05, %v501_v41  ;;  %v498_v45 = vsub.f32 %v490_v43, %v494_v40  ;;  %v495_v46 = vmul.f32 %v471_v42, %v471_v42 }
 0x198   :  { %v485_v47 = vpop.xlane.xlu1 %484  ;;  %v467_v48 = vpop.xlane.xlu0 %466 }
 0x199   :  { %859 = vrsqrt.f32 %v509_v44  ;;  %v502_v49 = vmax.f32 %v498_v45, 0.0  ;;  %v491_v50 = vmul.f32 0.0625, %v485_v47  ;;  %v472_v51 = vmul.f32 0.0625, %v467_v48 }
 0x19b   :  { %v510_v52 = vadd.f32 1e-05, %v502_v49  ;;  %v499_v53 = vsub.f32 %v491_v50, %v495_v46  ;;  %v496_v56 = vmul.f32 %v472_v51, %v472_v51 }
 0x19c   :  { %v488_v54 = vpop.xlane.xlu0 %487 }
 0x19d   :  { %861 = vrsqrt.f32 %v510_v52  ;;  %v503_v55 = vmax.f32 %v499_v53, 0.0  ;;  %v492_v57 = vmul.f32 0.0625, %v488_v54  ;;  %v600_v53 = vlaneseq }
 0x19f   :  { %v511_v58 = vadd.f32 1e-05, %v503_v55  ;;  %v500_v59 = vsub.f32 %v492_v57, %v496_v56 }
 0x1a1   :  { %863 = vrsqrt.f32 %v511_v58  ;;  %v504_v61 = vmax.f32 %v500_v59, 0.0 }
 0x1a3   :  { %v860_v0 = vpop.eup %859  ;;  %v512_v1 = vadd.f32 1e-05, %v504_v61 }
 0x1a4   :  { %v517_v2 = vmul.f32 %v860_v0, %v505_v62 }
 0x1a5   :  { %865 = vrsqrt.f32 %v512_v1 }
 0x1a6   :  { %535 = vperm.xlu1 %814, %v517_v2   ;;  %v525_v5 = vmul.f32 %v517_v2, %v469_v31 }
 0x1a7   :  { %v862_v6 = vpop.eup %861 }
 0x1a8   :  { %v529_v7 = vsub.f32 %v521_v3, %v525_v5  ;;  %v518_v8 = vmul.f32 %v862_v6, %v506_v4 }
 0x1aa   :  { %559 = vperm.xlu1 %814, %v529_v7   ;;  %540 = vperm.xlu0 %813, %v518_v8   ;;  %v526_v11 = vmul.f32 %v518_v8, %v470_v35 }
 0x1ab   :  { %v864_v12 = vpop.eup %863 }
 0x1ac   :  { %v519_v13 = vmul.f32 %v864_v12, %v507_v9  ;;  %v530_v14 = vsub.f32 %v522_v10, %v526_v11 }
 0x1ae   :  { %545 = vperm.xlu0 %813, %v519_v13   ;;  %564 = vperm.xlu1 %814, %v530_v14   ;;  %v527_v17 = vmul.f32 %v519_v13, %v471_v42 }
 0x1af   :  { %v866_v18 = vpop.eup %865 }
 0x1b0   :  { %v531_v20 = vsub.f32 %v523_v15, %v527_v17  ;;  %v520_v22 = vmul.f32 %v866_v18, %v508_v16 }
 0x1b2   :  { %569 = vperm.xlu0 %813, %v531_v20   ;;  %550 = vperm.xlu1 %814, %v520_v22   ;;  %v528_v24 = vmul.f32 %v520_v22, %v472_v51 }
 0x1b4   :  { %v532_v26 = vsub.f32 %v524_v23, %v528_v24 }
 0x1b6   :  { %597 = vperm.xlu0 %813, %v594_v25   ;;  %574 = vperm.xlu1 %814, %v532_v26  }
 0x225   :  { %v536_v29 = vpop.permute.xlu1 %535 }
 0x226   :  { %v553_v30 = vmul.f32 %v536_v29, %v1047_v60 }
 0x229   :  { %v560_v31 = vpop.permute.xlu1 %559  ;;  %v541_v32 = vpop.permute.xlu0 %540 }
 0x22a   :  { %v577_v33 = vadd.f32 %v560_v31, %v553_v30  ;;  %v554_v34 = vmul.f32 %v541_v32, %v1049_v63 }
 0x22c   :  { %v585_v37 = vmul.f32 0.2, %v577_v33  ;;  %vm581_vm2 = vcmp.ge.f32.partialorder %v577_v33, 0.0 }
 0x22d   :  { %v565_v35 = vpop.permute.xlu1 %564  ;;  %v546_v36 = vpop.permute.xlu0 %545 }
 0x22e   :  { %v578_v38 = vadd.f32 %v565_v35, %v554_v34  ;;  %v555_v40 = vmul.f32 %v546_v36, %v1060_v19  ;;  %v589_v43 = vsel %vm581_vm2, %v577_v33, %v585_v37  ;;  %v593_v19 = vld [vmem:[%s1118_s5] sm:$0x1] }
 0x230   :  { %vm582_vm3 = vcmp.ge.f32.partialorder %v578_v38, 0.0  ;;  %v586_v39 = vmul.f32 0.2, %v578_v38 }
 0x231   :  { %v551_v41 = vpop.permute.xlu1 %550  ;;  %v570_v42 = vpop.permute.xlu0 %569 }
 0x232   :  { %v590_v44 = vsel %vm582_vm3, %v578_v38, %v586_v39  ;;  %v579_v45 = vadd.f32 %v570_v42, %v555_v40  ;;  %v556_v46 = vmul.f32 %v551_v41, %v1062_v21  ;;  %v601_v21 = vshrl.u32 %v600_v53, 7 }
 0x233   :  { %v804_v60 = vpack.c.bf16 %v590_v44, %v589_v43 }
 0x234   :  { %v587_v63 = vmul.f32 0.2, %v579_v45  ;;  %vm583_vm4 = vcmp.ge.f32.partialorder %v579_v45, 0.0  ;;  %v602_v54 = vsub.s32 0, %v601_v21 }
 0x235   :  { %v575_v47 = vpop.permute.xlu1 %574  ;;  %805 = vmatpush3.bf16.msra.mxu0 %v804_v60  ;;  %v598_v55 = vpop.permute.xlu0 %597 }
 0x236   :  { %v580_v48 = vadd.f32 %v575_v47, %v556_v46  ;;  %806 = vmatprep.subr.bf16.mxu0 %v872_v27  ;;  %v591_v50 = vsel %vm583_vm4, %v579_v45, %v587_v63  ;;  %v603_v56 = vrot.slane %v598_v55, %v602_v54 }
 0x238   :  { %vm584_vm5 = vcmp.ge.f32.partialorder %v580_v48, 0.0  ;;  %v588_v49 = vmul.f32 0.2, %v580_v48 }
 0x23a   :  { %v592_v51 = vsel %vm584_vm5, %v580_v48, %v588_v49 }
 0x23b   :  { %v807_v52 = vpack.c.bf16 %v592_v51, %v591_v50 }
 0x23d   :  { %808 = vmatpush3.bf16.msra.mxu0 %v807_v52 }
 0x240   :  { %801 = vmatmul.mubr.msk.f32.vlgmr.msra.gmra.mrb[8].mxu0 %vm604_vm6, %v593_v19 }
 0x313   :  { %v674_v57 = vpop.f32.mrb[8].mxu0 }
 0x314   :  { %v675_v58 = vadd.f32 %v674_v57, %v603_v56  ;;  %v802_v59 = vpop.f32.mrb[9].mxu0 }
 0x316   :  { %v678_v61 = vsub.f32 0.0, %v675_v58 }
 0x318   :  { %v679_v62 = vmul.f32 1.442695, %v678_v61 }
 0x31a   :  { %867 = vpow2.f32 %v679_v62 }
 0x324   :  { %v868_v0 = vpop.eup %867 }
 0x325   :  { %v681_v1 = vadd.f32 1.0, %v868_v0 }
 0x327   :  { %869 = vrcp.f32 %v681_v1 }
 0x331   :  { %v870_v2 = vpop.eup %869 }
 0x332   :  { %685 = vst.msk [vmem:[%s1119_s7] sm:$0x1] %vm684_vm7, %v870_v2 }

</bundles_post_ra>
